<compile_context>
chip_gen: v5e
topology: v5e:2x2
jax: 0.10.0
libtpu: 0.0.40
codegen_flags: <defaults>
</compile_context>

<pallas_src>
import jax
import jax.numpy as jnp
from jax.experimental import pallas as pl
from jax.experimental.pallas import tpu as pltpu


def _tensorcores_per_chip():
    """Best-effort TensorCores-per-chip (megacore) detection. Perf-only."""
    try:
        kind = jax.devices()[0].device_kind.lower()
    except Exception:
        return 1
    if "v4" in kind or "v7" in kind or "7x" in kind:
        return 2
    if "v5" in kind and "lite" not in kind and "v5e" not in kind:
        return 2  # v5p megacore
    return 1


def _make_kernel(nb, c_in, t1, cdtype):
    f32 = jnp.float32
    GUARD = 8            # top guard rows in each activation scratch (aligned stores)
    S = t1 + 3           # padded length / 16 per sample

    def pool_conv3_relu(src_ref, t, w_ref, bias):
        """MaxPool1d(2) of the activation stored in src_ref, then
        Conv1d(kernel=3, stride=1, pad=1) + ReLU, for nb samples stacked
        along the sublane (time) axis.

        src_ref rows [GUARD, GUARD + 2*nb*t) hold the previous activation.
        Guard rows / cross-sample neighbour rows are read as stale
        "don't-care" VMEM data and are removed below with a TRUE SELECT
        (jnp.where).  Do NOT convert the masking to multiply-by-mask: NaN/Inf
        garbage in guard rows would then propagate.
        """
        m = nb * t                               # pooled rows over all samples
        c = src_ref.shape[1]

        def rd(off):                             # strided "pooled" read
            return src_ref[pl.ds(off, m, stride=2), :]

        x_prev = jnp.maximum(rd(GUARD - 2), rd(GUARD - 1))   # pooled[r-1]
        x_mid = jnp.maximum(rd(GUARD), rd(GUARD + 1))        # pooled[r]
        x_next = jnp.maximum(rd(GUARD + 2), rd(GUARD + 3))   # pooled[r+1]

        # Rows whose neighbour would cross a sample boundary get the conv's
        # "same" zero padding, per stacked sample.
        row = jax.lax.broadcasted_iota(jnp.int32, (m, c), 0)
        first = row == 0
        last = row == t - 1
        for s in range(1, nb):                   # nb is a Python constant
            first = jnp.logical_or(first, row == s * t)
            last = jnp.logical_or(last, row == (s + 1) * t - 1)
        x_prev = jnp.where(first, 0.0, x_prev)
        x_next = jnp.where(last, 0.0, x_next)

        # Three accumulating MXU matmuls (one per tap); no lane concat.
        y = jnp.dot(x_prev.astype(cdtype), w_ref[0], preferred_element_type=f32)
        y = y + jnp.dot(x_mid.astype(cdtype), w_ref[1], preferred_element_type=f32)
        y = y + jnp.dot(x_next.astype(cdtype), w_ref[2], preferred_element_type=f32)
        return jnp.maximum(y + bias, 0.0)

    def kernel(x_ref, w1_ref, w2_ref, w3_ref, w4_ref, w5_ref, b_ref,
               out_ref, a1, a2, a3, a4):
        # ---- conv1 (kernel 64, stride 16, pad 24) + ReLU -------------------
        # Built from the UN-replicated input slab: for each sample, 4*C_in
        # accumulating matmuls against (16,16) weight slices.  The "fold"
        # shift j is a static sublane offset into the input ref, so no 4x
        # im2col replication ever touches HBM.
        bias1 = b_ref[0:1, 0:16]
        for b in range(nb):
            acc = None
            for ci in range(c_in):
                for j in range(4):
                    base = (b * c_in + ci) * S + j            # static offset
                    d = jnp.dot(x_ref[0, pl.ds(base, t1), :], w1_ref[ci * 4 + j],
                                preferred_element_type=f32)
                    acc = d if acc is None else acc + d
            a1[pl.ds(GUARD + b * t1, t1), :] = jnp.maximum(acc + bias1, 0.0)

        # ---- pool -> conv3 -> relu chain -----------------------------------
        a2[pl.ds(GUARD, nb * t1 // 2), :] = pool_conv3_relu(
            a1, t1 // 2, w2_ref, b_ref[1:2, 0:32])
        a3[pl.ds(GUARD, nb * t1 // 4), :] = pool_conv3_relu(
            a2, t1 // 4, w3_ref, b_ref[2:3, 0:64])
        a4[pl.ds(GUARD, nb * t1 // 8), :] = pool_conv3_relu(
            a3, t1 // 8, w4_ref, b_ref[3:4, 0:64])
        out_ref[0] = pool_conv3_relu(a4, t1 // 16, w5_ref, b_ref[4:5, 0:64])

    return kernel


def feature_extractor_2(x, params, nb=None, compute_dtype=jnp.bfloat16):
    """x: (B, C_in, L) float32 (NCL).  Returns (B, 64, L // 256) float32 (NCL)."""
    B, C_in, L = x.shape
    assert L % 16 == 0, "L must be a multiple of 16"
    T1 = L // 16                                # conv1 output length
    assert T1 % 16 == 0, "need four exact 2x max-pools"
    S = T1 + 3                                  # padded length / 16
    Tout = T1 // 16
    f32 = jnp.float32
    cdtype = compute_dtype
    isz = jnp.dtype(cdtype).itemsize

    # ---- VMEM footprint estimate (double-buffered blocks + scratch) --------
    def est_vmem(nb_):
        in_blk = nb_ * C_in * S * 16 * isz
        out_blk = nb_ * Tout * 64 * 4
        wts = (C_in * 4 * 16 * 16 + 3 * 16 * 32 + 3 * 32 * 64
               + 2 * 3 * 64 * 64) * isz + 8 * 64 * 4
        scr = ((nb_ * T1 + 16) * 16 + (nb_ * T1 // 2 + 16) * 32 +
               (nb_ * T1 // 4 + 16) * 64 + (nb_ * T1 // 8 + 16) * 64) * 4
        return 2 * (in_blk + out_blk + wts) + scr

    # ---- generation-aware choice of samples-per-grid-step ------------------
    n_tc = _tensorcores_per_chip()
    if nb is None:
        budget = 28 * 1024 * 1024
        cands = [d for d in range(1, min(B, 8) + 1)
                 if B % d == 0 and est_vmem(d) <= budget]
        if not cands:
            cands = [1]
        if n_tc >= 2:
            multi = [d for d in cands if B // d >= n_tc]   # keep both TCs busy
            if multi:
                cands = multi
        nb = max(cands)
    assert B % nb == 0
    G = B // nb
    vmem_limit = int(min(max(est_vmem(nb) + (16 << 20), 32 << 20), 48 << 20))

    # ---- layout glue: pad + reshape only (NO 4x replication, NO transpose) --
    xp = jnp.pad(x.astype(cdtype), ((0, 0), (0, 0), (24, 24)))
    xr = xp.reshape(B, C_in, S, 16).reshape(G, nb * C_in * S, 16)

    # conv1 weights: w1p[c*4+j][r, o] = w1[o, c, 16*j + r]
    w1 = params["w1"]                            # (16, C_in, 64)
    w1p = (w1.reshape(16, C_in, 4, 16)
             .transpose(1, 2, 3, 0)
             .reshape(C_in * 4, 16, 16)).astype(cdtype)

    def prep3(w):                                # (C_out, C_in, 3) -> (3, C_in, C_out)
        return w.transpose(2, 1, 0).astype(cdtype)

    w2 = prep3(params["w2"])
    w3 = prep3(params["w3"])
    w4 = prep3(params["w4"])
    w5 = prep3(params["w5"])

    bias = jnp.zeros((8, 64), f32)
    bias = bias.at[0, :16].set(params["b1"])
    bias = bias.at[1, :32].set(params["b2"])
    bias = bias.at[2, :64].set(params["b3"])
    bias = bias.at[3, :64].set(params["b4"])
    bias = bias.at[4, :64].set(params["b5"])

    def full_spec(a):
        n = a.ndim
        return pl.BlockSpec(a.shape, lambda g, n=n: (0,) * n)

    out = pl.pallas_call(
        _make_kernel(nb, C_in, T1, cdtype),
        out_shape=jax.ShapeDtypeStruct((G, nb * Tout, 64), f32),
        grid=(G,),
        in_specs=[
            pl.BlockSpec((1, nb * C_in * S, 16), lambda g: (g, 0, 0)),
            full_spec(w1p),
            full_spec(w2), full_spec(w3), full_spec(w4), full_spec(w5),
            full_spec(bias),
        ],
        out_specs=pl.BlockSpec((1, nb * Tout, 64), lambda g: (g, 0, 0)),
        scratch_shapes=[
            pltpu.VMEM((nb * T1 + 16, 16), f32),        # a1 (+ guard rows)
            pltpu.VMEM((nb * T1 // 2 + 16, 32), f32),   # a2
            pltpu.VMEM((nb * T1 // 4 + 16, 64), f32),   # a3
            pltpu.VMEM((nb * T1 // 8 + 16, 64), f32),   # a4
        ],
        compiler_params=pltpu.CompilerParams(
            dimension_semantics=("parallel",),
            vmem_limit_bytes=vmem_limit),
    )(xr, w1p, w2, w3, w4, w5, bias)

    return out.reshape(B, Tout, 64).transpose(0, 2, 1)   # back to NCL


def init_params(key, in_channels):
    """Deterministic PyTorch-default-style init (U(-1/sqrt(fan_in), +))."""
    def conv_init(k, out_c, in_c, ksz):
        k1, k2 = jax.random.split(k)
        bound = 1.0 / (in_c * ksz) ** 0.5
        w = jax.random.uniform(k1, (out_c, in_c, ksz), jnp.float32, -bound, bound)
        b = jax.random.uniform(k2, (out_c,), jnp.float32, -bound, bound)
        return w, b
    ks = jax.random.split(key, 5)
    p = {}
    p["w1"], p["b1"] = conv_init(ks[0], 16, in_channels, 64)
    p["w2"], p["b2"] = conv_init(ks[1], 32, 16, 3)
    p["w3"], p["b3"] = conv_init(ks[2], 64, 32, 3)
    p["w4"], p["b4"] = conv_init(ks[3], 64, 64, 3)
    p["w5"], p["b5"] = conv_init(ks[4], 64, 64, 3)
    return p


def ref_forward(x, p):
    """Pure-JAX f32 reference matching the PyTorch module semantics."""
    def conv(h, w, b, stride, pad):
        y = jax.lax.conv_general_dilated(
            h, w, window_strides=(stride,), padding=[(pad, pad)],
            dimension_numbers=("NCH", "OIH", "NCH"),
            precision=jax.lax.Precision.HIGHEST)
        return y + b[None, :, None]

    def pool(h):
        B, C, L = h.shape
        return jnp.max(h.reshape(B, C, L // 2, 2), axis=-1)

    h = pool(jax.nn.relu(conv(x, p["w1"], p["b1"], 16, 24)))
    h = pool(jax.nn.relu(conv(h, p["w2"], p["b2"], 1, 1)))
    h = pool(jax.nn.relu(conv(h, p["w3"], p["b3"], 1, 1)))
    h = pool(jax.nn.relu(conv(h, p["w4"], p["b4"], 1, 1)))
    h = jax.nn.relu(conv(h, p["w5"], p["b5"], 1, 1))
    return h


if __name__ == "__main__":
    key = jax.random.PRNGKey(0)
    kx, kp = jax.random.split(key)

    B, C_in, L = 2, 2, 512        # args.in_channels = 2; signal length 512
    x = jax.random.normal(kx, (B, C_in, L), jnp.float32)
    params = init_params(kp, C_in)

    ref = jax.block_until_ready(ref_forward(x, params))
    assert ref.shape == (B, 64, L // 256)

    # Exact-semantics path (f32 matmul operands): tight tolerance.
    out_f32 = jax.block_until_ready(
        feature_extractor_2(x, params, compute_dtype=jnp.float32))
    assert out_f32.shape == ref.shape, (out_f32.shape, ref.shape)
    err_f32 = float(jnp.max(jnp.abs(out_f32 - ref)))
    assert err_f32 < 2e-3, f"f32 mismatch vs reference: max abs err = {err_f32}"

    # Fast path (bf16 matmul operands, f32 accumulation): looser tolerance.
    out_bf16 = jax.block_until_ready(
        feature_extractor_2(x, params, compute_dtype=jnp.bfloat16))
    assert out_bf16.shape == ref.shape, (out_bf16.shape, ref.shape)
    err_bf16 = float(jnp.max(jnp.abs(out_bf16 - ref)))
    assert err_bf16 < 2e-2, f"bf16 mismatch vs reference: max abs err = {err_bf16}"

    print("KERNEL_OK")
</pallas_src>

<mosaic_0001>
module attributes {stable_mosaic.version = 11 : i64} {
  func.func @kernel(%arg0: i32, %arg1: memref<1x140x16xf32, #tpu.memory_space<vmem>>, %arg2: memref<8x16x16xf32, #tpu.memory_space<vmem>>, %arg3: memref<3x16x32xf32, #tpu.memory_space<vmem>>, %arg4: memref<3x32x64xf32, #tpu.memory_space<vmem>>, %arg5: memref<3x64x64xf32, #tpu.memory_space<vmem>>, %arg6: memref<3x64x64xf32, #tpu.memory_space<vmem>>, %arg7: memref<8x64xf32, #tpu.memory_space<vmem>>, %arg8: memref<1x4x64xf32, #tpu.memory_space<vmem>>, %arg9: memref<80x16xf32, #tpu.memory_space<vmem>>, %arg10: memref<48x32xf32, #tpu.memory_space<vmem>>, %arg11: memref<32x64xf32, #tpu.memory_space<vmem>>, %arg12: memref<24x64xf32, #tpu.memory_space<vmem>>) attributes {dimension_semantics = [#tpu.dimension_semantics<parallel>], iteration_bounds = array<i64: 1>, scalar_prefetch = 0 : i64, scratch_operands = 4 : i64, tpu.core_type = #tpu.core_type<tc>, window_params = [{transform_indices = @transform_0, window_bounds = array<i64: 1, 140, 16>}, {pipeline_mode = #tpu.pipeline_mode<synchronous>, transform_indices = @transform_1, window_bounds = array<i64: 8, 16, 16>}, {pipeline_mode = #tpu.pipeline_mode<synchronous>, transform_indices = @transform_2, window_bounds = array<i64: 3, 16, 32>}, {pipeline_mode = #tpu.pipeline_mode<synchronous>, transform_indices = @transform_3, window_bounds = array<i64: 3, 32, 64>}, {pipeline_mode = #tpu.pipeline_mode<synchronous>, transform_indices = @transform_4, window_bounds = array<i64: 3, 64, 64>}, {pipeline_mode = #tpu.pipeline_mode<synchronous>, transform_indices = @transform_5, window_bounds = array<i64: 3, 64, 64>}, {pipeline_mode = #tpu.pipeline_mode<synchronous>, transform_indices = @transform_6, window_bounds = array<i64: 8, 64>}, {transform_indices = @transform_7, window_bounds = array<i64: 1, 4, 64>}]} {
    %c0 = arith.constant 0 : index
    %c0_0 = arith.constant 0 : index
    %0 = vector.load %arg7[%c0, %c0_0] : memref<8x64xf32, #tpu.memory_space<vmem>>, vector<1x16xf32>
    %c0_1 = arith.constant 0 : index
    %c0_2 = arith.constant 0 : index
    %c0_3 = arith.constant 0 : index
    %1 = vector.load %arg1[%c0_1, %c0_2, %c0_3] : memref<1x140x16xf32, #tpu.memory_space<vmem>>, vector<1x32x16xf32>
    %2 = vector.shape_cast %1 : vector<1x32x16xf32> to vector<32x16xf32>
    %c0_4 = arith.constant 0 : index
    %c0_5 = arith.constant 0 : index
    %c0_6 = arith.constant 0 : index
    %3 = vector.load %arg2[%c0_4, %c0_5, %c0_6] : memref<8x16x16xf32, #tpu.memory_space<vmem>>, vector<1x16x16xf32>
    %4 = vector.shape_cast %3 : vector<1x16x16xf32> to vector<16x16xf32>
    %cst = arith.constant dense<0.000000e+00> : vector<32x16xf32>
    %5 = tpu.matmul %2, %4, %cst {dimension_numbers = #tpu.dot_dimension_numbers<[1], [0], [0], [1], [0, 0, 1, 1], [], []>} : vector<32x16xf32>, vector<16x16xf32>, vector<32x16xf32> -> vector<32x16xf32>
    %c0_7 = arith.constant 0 : index
    %c1 = arith.constant 1 : index
    %c0_8 = arith.constant 0 : index
    %6 = vector.load %arg1[%c0_7, %c1, %c0_8] : memref<1x140x16xf32, #tpu.memory_space<vmem>>, vector<1x32x16xf32>
    %7 = vector.shape_cast %6 : vector<1x32x16xf32> to vector<32x16xf32>
    %c1_9 = arith.constant 1 : index
    %c0_10 = arith.constant 0 : index
    %c0_11 = arith.constant 0 : index
    %8 = vector.load %arg2[%c1_9, %c0_10, %c0_11] : memref<8x16x16xf32, #tpu.memory_space<vmem>>, vector<1x16x16xf32>
    %9 = vector.shape_cast %8 : vector<1x16x16xf32> to vector<16x16xf32>
    %cst_12 = arith.constant dense<0.000000e+00> : vector<32x16xf32>
    %10 = tpu.matmul %7, %9, %cst_12 {dimension_numbers = #tpu.dot_dimension_numbers<[1], [0], [0], [1], [0, 0, 1, 1], [], []>} : vector<32x16xf32>, vector<16x16xf32>, vector<32x16xf32> -> vector<32x16xf32>
    %11 = arith.addf %5, %10 : vector<32x16xf32>
    %c0_13 = arith.constant 0 : index
    %c2 = arith.constant 2 : index
    %c0_14 = arith.constant 0 : index
    %12 = vector.load %arg1[%c0_13, %c2, %c0_14] : memref<1x140x16xf32, #tpu.memory_space<vmem>>, vector<1x32x16xf32>
    %13 = vector.shape_cast %12 : vector<1x32x16xf32> to vector<32x16xf32>
    %c2_15 = arith.constant 2 : index
    %c0_16 = arith.constant 0 : index
    %c0_17 = arith.constant 0 : index
    %14 = vector.load %arg2[%c2_15, %c0_16, %c0_17] : memref<8x16x16xf32, #tpu.memory_space<vmem>>, vector<1x16x16xf32>
    %15 = vector.shape_cast %14 : vector<1x16x16xf32> to vector<16x16xf32>
    %cst_18 = arith.constant dense<0.000000e+00> : vector<32x16xf32>
    %16 = tpu.matmul %13, %15, %cst_18 {dimension_numbers = #tpu.dot_dimension_numbers<[1], [0], [0], [1], [0, 0, 1, 1], [], []>} : vector<32x16xf32>, vector<16x16xf32>, vector<32x16xf32> -> vector<32x16xf32>
    %17 = arith.addf %11, %16 : vector<32x16xf32>
    %c0_19 = arith.constant 0 : index
    %c3 = arith.constant 3 : index
    %c0_20 = arith.constant 0 : index
    %18 = vector.load %arg1[%c0_19, %c3, %c0_20] : memref<1x140x16xf32, #tpu.memory_space<vmem>>, vector<1x32x16xf32>
    %19 = vector.shape_cast %18 : vector<1x32x16xf32> to vector<32x16xf32>
    %c3_21 = arith.constant 3 : index
    %c0_22 = arith.constant 0 : index
    %c0_23 = arith.constant 0 : index
    %20 = vector.load %arg2[%c3_21, %c0_22, %c0_23] : memref<8x16x16xf32, #tpu.memory_space<vmem>>, vector<1x16x16xf32>
    %21 = vector.shape_cast %20 : vector<1x16x16xf32> to vector<16x16xf32>
    %cst_24 = arith.constant dense<0.000000e+00> : vector<32x16xf32>
    %22 = tpu.matmul %19, %21, %cst_24 {dimension_numbers = #tpu.dot_dimension_numbers<[1], [0], [0], [1], [0, 0, 1, 1], [], []>} : vector<32x16xf32>, vector<16x16xf32>, vector<32x16xf32> -> vector<32x16xf32>
    %23 = arith.addf %17, %22 : vector<32x16xf32>
    %c0_25 = arith.constant 0 : index
    %c35 = arith.constant 35 : index
    %c0_26 = arith.constant 0 : index
    %24 = vector.load %arg1[%c0_25, %c35, %c0_26] : memref<1x140x16xf32, #tpu.memory_space<vmem>>, vector<1x32x16xf32>
    %25 = vector.shape_cast %24 : vector<1x32x16xf32> to vector<32x16xf32>
    %c4 = arith.constant 4 : index
    %c0_27 = arith.constant 0 : index
    %c0_28 = arith.constant 0 : index
    %26 = vector.load %arg2[%c4, %c0_27, %c0_28] : memref<8x16x16xf32, #tpu.memory_space<vmem>>, vector<1x16x16xf32>
    %27 = vector.shape_cast %26 : vector<1x16x16xf32> to vector<16x16xf32>
    %cst_29 = arith.constant dense<0.000000e+00> : vector<32x16xf32>
    %28 = tpu.matmul %25, %27, %cst_29 {dimension_numbers = #tpu.dot_dimension_numbers<[1], [0], [0], [1], [0, 0, 1, 1], [], []>} : vector<32x16xf32>, vector<16x16xf32>, vector<32x16xf32> -> vector<32x16xf32>
    %29 = arith.addf %23, %28 : vector<32x16xf32>
    %c0_30 = arith.constant 0 : index
    %c36 = arith.constant 36 : index
    %c0_31 = arith.constant 0 : index
    %30 = vector.load %arg1[%c0_30, %c36, %c0_31] : memref<1x140x16xf32, #tpu.memory_space<vmem>>, vector<1x32x16xf32>
    %31 = vector.shape_cast %30 : vector<1x32x16xf32> to vector<32x16xf32>
    %c5 = arith.constant 5 : index
    %c0_32 = arith.constant 0 : index
    %c0_33 = arith.constant 0 : index
    %32 = vector.load %arg2[%c5, %c0_32, %c0_33] : memref<8x16x16xf32, #tpu.memory_space<vmem>>, vector<1x16x16xf32>
    %33 = vector.shape_cast %32 : vector<1x16x16xf32> to vector<16x16xf32>
    %cst_34 = arith.constant dense<0.000000e+00> : vector<32x16xf32>
    %34 = tpu.matmul %31, %33, %cst_34 {dimension_numbers = #tpu.dot_dimension_numbers<[1], [0], [0], [1], [0, 0, 1, 1], [], []>} : vector<32x16xf32>, vector<16x16xf32>, vector<32x16xf32> -> vector<32x16xf32>
    %35 = arith.addf %29, %34 : vector<32x16xf32>
    %c0_35 = arith.constant 0 : index
    %c37 = arith.constant 37 : index
    %c0_36 = arith.constant 0 : index
    %36 = vector.load %arg1[%c0_35, %c37, %c0_36] : memref<1x140x16xf32, #tpu.memory_space<vmem>>, vector<1x32x16xf32>
    %37 = vector.shape_cast %36 : vector<1x32x16xf32> to vector<32x16xf32>
    %c6 = arith.constant 6 : index
    %c0_37 = arith.constant 0 : index
    %c0_38 = arith.constant 0 : index
    %38 = vector.load %arg2[%c6, %c0_37, %c0_38] : memref<8x16x16xf32, #tpu.memory_space<vmem>>, vector<1x16x16xf32>
    %39 = vector.shape_cast %38 : vector<1x16x16xf32> to vector<16x16xf32>
    %cst_39 = arith.constant dense<0.000000e+00> : vector<32x16xf32>
    %40 = tpu.matmul %37, %39, %cst_39 {dimension_numbers = #tpu.dot_dimension_numbers<[1], [0], [0], [1], [0, 0, 1, 1], [], []>} : vector<32x16xf32>, vector<16x16xf32>, vector<32x16xf32> -> vector<32x16xf32>
    %41 = arith.addf %35, %40 : vector<32x16xf32>
    %c0_40 = arith.constant 0 : index
    %c38 = arith.constant 38 : index
    %c0_41 = arith.constant 0 : index
    %42 = vector.load %arg1[%c0_40, %c38, %c0_41] : memref<1x140x16xf32, #tpu.memory_space<vmem>>, vector<1x32x16xf32>
    %43 = vector.shape_cast %42 : vector<1x32x16xf32> to vector<32x16xf32>
    %c7 = arith.constant 7 : index
    %c0_42 = arith.constant 0 : index
    %c0_43 = arith.constant 0 : index
    %44 = vector.load %arg2[%c7, %c0_42, %c0_43] : memref<8x16x16xf32, #tpu.memory_space<vmem>>, vector<1x16x16xf32>
    %45 = vector.shape_cast %44 : vector<1x16x16xf32> to vector<16x16xf32>
    %cst_44 = arith.constant dense<0.000000e+00> : vector<32x16xf32>
    %46 = tpu.matmul %43, %45, %cst_44 {dimension_numbers = #tpu.dot_dimension_numbers<[1], [0], [0], [1], [0, 0, 1, 1], [], []>} : vector<32x16xf32>, vector<16x16xf32>, vector<32x16xf32> -> vector<32x16xf32>
    %47 = arith.addf %41, %46 : vector<32x16xf32>
    %48 = vector.broadcast %0 : vector<1x16xf32> to vector<32x16xf32>
    %49 = arith.addf %47, %48 : vector<32x16xf32>
    %cst_45 = arith.constant 0.000000e+00 : f32
    %50 = vector.broadcast %cst_45 : f32 to vector<32x16xf32>
    %51 = arith.maximumf %49, %50 : vector<32x16xf32>
    %c8 = arith.constant 8 : index
    %c0_46 = arith.constant 0 : index
    %52 = vector.load %arg9[%c8, %c0_46] : memref<80x16xf32, #tpu.memory_space<vmem>>, vector<32x16xf32>
    tpu.vector_store %arg9[%c8, %c0_46], %51 {strides = array<i32>} : memref<80x16xf32, #tpu.memory_space<vmem>>, vector<32x16xf32>,
    %c0_47 = arith.constant 0 : index
    %c70 = arith.constant 70 : index
    %c0_48 = arith.constant 0 : index
    %53 = vector.load %arg1[%c0_47, %c70, %c0_48] : memref<1x140x16xf32, #tpu.memory_space<vmem>>, vector<1x32x16xf32>
    %54 = vector.shape_cast %53 : vector<1x32x16xf32> to vector<32x16xf32>
    %c0_49 = arith.constant 0 : index
    %c0_50 = arith.constant 0 : index
    %c0_51 = arith.constant 0 : index
    %55 = vector.load %arg2[%c0_49, %c0_50, %c0_51] : memref<8x16x16xf32, #tpu.memory_space<vmem>>, vector<1x16x16xf32>
    %56 = vector.shape_cast %55 : vector<1x16x16xf32> to vector<16x16xf32>
    %cst_52 = arith.constant dense<0.000000e+00> : vector<32x16xf32>
    %57 = tpu.matmul %54, %56, %cst_52 {dimension_numbers = #tpu.dot_dimension_numbers<[1], [0], [0], [1], [0, 0, 1, 1], [], []>} : vector<32x16xf32>, vector<16x16xf32>, vector<32x16xf32> -> vector<32x16xf32>
    %c0_53 = arith.constant 0 : index
    %c71 = arith.constant 71 : index
    %c0_54 = arith.constant 0 : index
    %58 = vector.load %arg1[%c0_53, %c71, %c0_54] : memref<1x140x16xf32, #tpu.memory_space<vmem>>, vector<1x32x16xf32>
    %59 = vector.shape_cast %58 : vector<1x32x16xf32> to vector<32x16xf32>
    %c1_55 = arith.constant 1 : index
    %c0_56 = arith.constant 0 : index
    %c0_57 = arith.constant 0 : index
    %60 = vector.load %arg2[%c1_55, %c0_56, %c0_57] : memref<8x16x16xf32, #tpu.memory_space<vmem>>, vector<1x16x16xf32>
    %61 = vector.shape_cast %60 : vector<1x16x16xf32> to vector<16x16xf32>
    %cst_58 = arith.constant dense<0.000000e+00> : vector<32x16xf32>
    %62 = tpu.matmul %59, %61, %cst_58 {dimension_numbers = #tpu.dot_dimension_numbers<[1], [0], [0], [1], [0, 0, 1, 1], [], []>} : vector<32x16xf32>, vector<16x16xf32>, vector<32x16xf32> -> vector<32x16xf32>
    %63 = arith.addf %57, %62 : vector<32x16xf32>
    %c0_59 = arith.constant 0 : index
    %c72 = arith.constant 72 : index
    %c0_60 = arith.constant 0 : index
    %64 = vector.load %arg1[%c0_59, %c72, %c0_60] : memref<1x140x16xf32, #tpu.memory_space<vmem>>, vector<1x32x16xf32>
    %65 = vector.shape_cast %64 : vector<1x32x16xf32> to vector<32x16xf32>
    %c2_61 = arith.constant 2 : index
    %c0_62 = arith.constant 0 : index
    %c0_63 = arith.constant 0 : index
    %66 = vector.load %arg2[%c2_61, %c0_62, %c0_63] : memref<8x16x16xf32, #tpu.memory_space<vmem>>, vector<1x16x16xf32>
    %67 = vector.shape_cast %66 : vector<1x16x16xf32> to vector<16x16xf32>
    %cst_64 = arith.constant dense<0.000000e+00> : vector<32x16xf32>
    %68 = tpu.matmul %65, %67, %cst_64 {dimension_numbers = #tpu.dot_dimension_numbers<[1], [0], [0], [1], [0, 0, 1, 1], [], []>} : vector<32x16xf32>, vector<16x16xf32>, vector<32x16xf32> -> vector<32x16xf32>
    %69 = arith.addf %63, %68 : vector<32x16xf32>
    %c0_65 = arith.constant 0 : index
    %c73 = arith.constant 73 : index
    %c0_66 = arith.constant 0 : index
    %70 = vector.load %arg1[%c0_65, %c73, %c0_66] : memref<1x140x16xf32, #tpu.memory_space<vmem>>, vector<1x32x16xf32>
    %71 = vector.shape_cast %70 : vector<1x32x16xf32> to vector<32x16xf32>
    %c3_67 = arith.constant 3 : index
    %c0_68 = arith.constant 0 : index
    %c0_69 = arith.constant 0 : index
    %72 = vector.load %arg2[%c3_67, %c0_68, %c0_69] : memref<8x16x16xf32, #tpu.memory_space<vmem>>, vector<1x16x16xf32>
    %73 = vector.shape_cast %72 : vector<1x16x16xf32> to vector<16x16xf32>
    %cst_70 = arith.constant dense<0.000000e+00> : vector<32x16xf32>
    %74 = tpu.matmul %71, %73, %cst_70 {dimension_numbers = #tpu.dot_dimension_numbers<[1], [0], [0], [1], [0, 0, 1, 1], [], []>} : vector<32x16xf32>, vector<16x16xf32>, vector<32x16xf32> -> vector<32x16xf32>
    %75 = arith.addf %69, %74 : vector<32x16xf32>
    %c0_71 = arith.constant 0 : index
    %c105 = arith.constant 105 : index
    %c0_72 = arith.constant 0 : index
    %76 = vector.load %arg1[%c0_71, %c105, %c0_72] : memref<1x140x16xf32, #tpu.memory_space<vmem>>, vector<1x32x16xf32>
    %77 = vector.shape_cast %76 : vector<1x32x16xf32> to vector<32x16xf32>
    %c4_73 = arith.constant 4 : index
    %c0_74 = arith.constant 0 : index
    %c0_75 = arith.constant 0 : index
    %78 = vector.load %arg2[%c4_73, %c0_74, %c0_75] : memref<8x16x16xf32, #tpu.memory_space<vmem>>, vector<1x16x16xf32>
    %79 = vector.shape_cast %78 : vector<1x16x16xf32> to vector<16x16xf32>
    %cst_76 = arith.constant dense<0.000000e+00> : vector<32x16xf32>
    %80 = tpu.matmul %77, %79, %cst_76 {dimension_numbers = #tpu.dot_dimension_numbers<[1], [0], [0], [1], [0, 0, 1, 1], [], []>} : vector<32x16xf32>, vector<16x16xf32>, vector<32x16xf32> -> vector<32x16xf32>
    %81 = arith.addf %75, %80 : vector<32x16xf32>
    %c0_77 = arith.constant 0 : index
    %c106 = arith.constant 106 : index
    %c0_78 = arith.constant 0 : index
    %82 = vector.load %arg1[%c0_77, %c106, %c0_78] : memref<1x140x16xf32, #tpu.memory_space<vmem>>, vector<1x32x16xf32>
    %83 = vector.shape_cast %82 : vector<1x32x16xf32> to vector<32x16xf32>
    %c5_79 = arith.constant 5 : index
    %c0_80 = arith.constant 0 : index
    %c0_81 = arith.constant 0 : index
    %84 = vector.load %arg2[%c5_79, %c0_80, %c0_81] : memref<8x16x16xf32, #tpu.memory_space<vmem>>, vector<1x16x16xf32>
    %85 = vector.shape_cast %84 : vector<1x16x16xf32> to vector<16x16xf32>
    %cst_82 = arith.constant dense<0.000000e+00> : vector<32x16xf32>
    %86 = tpu.matmul %83, %85, %cst_82 {dimension_numbers = #tpu.dot_dimension_numbers<[1], [0], [0], [1], [0, 0, 1, 1], [], []>} : vector<32x16xf32>, vector<16x16xf32>, vector<32x16xf32> -> vector<32x16xf32>
    %87 = arith.addf %81, %86 : vector<32x16xf32>
    %c0_83 = arith.constant 0 : index
    %c107 = arith.constant 107 : index
    %c0_84 = arith.constant 0 : index
    %88 = vector.load %arg1[%c0_83, %c107, %c0_84] : memref<1x140x16xf32, #tpu.memory_space<vmem>>, vector<1x32x16xf32>
    %89 = vector.shape_cast %88 : vector<1x32x16xf32> to vector<32x16xf32>
    %c6_85 = arith.constant 6 : index
    %c0_86 = arith.constant 0 : index
    %c0_87 = arith.constant 0 : index
    %90 = vector.load %arg2[%c6_85, %c0_86, %c0_87] : memref<8x16x16xf32, #tpu.memory_space<vmem>>, vector<1x16x16xf32>
    %91 = vector.shape_cast %90 : vector<1x16x16xf32> to vector<16x16xf32>
    %cst_88 = arith.constant dense<0.000000e+00> : vector<32x16xf32>
    %92 = tpu.matmul %89, %91, %cst_88 {dimension_numbers = #tpu.dot_dimension_numbers<[1], [0], [0], [1], [0, 0, 1, 1], [], []>} : vector<32x16xf32>, vector<16x16xf32>, vector<32x16xf32> -> vector<32x16xf32>
    %93 = arith.addf %87, %92 : vector<32x16xf32>
    %c0_89 = arith.constant 0 : index
    %c108 = arith.constant 108 : index
    %c0_90 = arith.constant 0 : index
    %94 = vector.load %arg1[%c0_89, %c108, %c0_90] : memref<1x140x16xf32, #tpu.memory_space<vmem>>, vector<1x32x16xf32>
    %95 = vector.shape_cast %94 : vector<1x32x16xf32> to vector<32x16xf32>
    %c7_91 = arith.constant 7 : index
    %c0_92 = arith.constant 0 : index
    %c0_93 = arith.constant 0 : index
    %96 = vector.load %arg2[%c7_91, %c0_92, %c0_93] : memref<8x16x16xf32, #tpu.memory_space<vmem>>, vector<1x16x16xf32>
    %97 = vector.shape_cast %96 : vector<1x16x16xf32> to vector<16x16xf32>
    %cst_94 = arith.constant dense<0.000000e+00> : vector<32x16xf32>
    %98 = tpu.matmul %95, %97, %cst_94 {dimension_numbers = #tpu.dot_dimension_numbers<[1], [0], [0], [1], [0, 0, 1, 1], [], []>} : vector<32x16xf32>, vector<16x16xf32>, vector<32x16xf32> -> vector<32x16xf32>
    %99 = arith.addf %93, %98 : vector<32x16xf32>
    %100 = vector.broadcast %0 : vector<1x16xf32> to vector<32x16xf32>
    %101 = arith.addf %99, %100 : vector<32x16xf32>
    %cst_95 = arith.constant 0.000000e+00 : f32
    %102 = vector.broadcast %cst_95 : f32 to vector<32x16xf32>
    %103 = arith.maximumf %101, %102 : vector<32x16xf32>
    %c40 = arith.constant 40 : index
    %c0_96 = arith.constant 0 : index
    %104 = vector.load %arg9[%c40, %c0_96] : memref<80x16xf32, #tpu.memory_space<vmem>>, vector<32x16xf32>
    tpu.vector_store %arg9[%c40, %c0_96], %103 {strides = array<i32>} : memref<80x16xf32, #tpu.memory_space<vmem>>, vector<32x16xf32>,
    %c1_97 = arith.constant 1 : index
    %c0_98 = arith.constant 0 : index
    %105 = vector.load %arg7[%c1_97, %c0_98] : memref<8x64xf32, #tpu.memory_space<vmem>>, vector<1x32xf32>
    %c6_99 = arith.constant 6 : index
    %c0_100 = arith.constant 0 : index
    %106 = tpu.strided_load %arg9[%c6_99, %c0_100] {strides = array<i32: 2, 1>} : memref<80x16xf32, #tpu.memory_space<vmem>>, vector<32x16xf32>
    %c7_101 = arith.constant 7 : index
    %c0_102 = arith.constant 0 : index
    %107 = tpu.strided_load %arg9[%c7_101, %c0_102] {strides = array<i32: 2, 1>} : memref<80x16xf32, #tpu.memory_space<vmem>>, vector<32x16xf32>
    %108 = arith.maximumf %106, %107 : vector<32x16xf32>
    %c8_103 = arith.constant 8 : index
    %c0_104 = arith.constant 0 : index
    %109 = tpu.strided_load %arg9[%c8_103, %c0_104] {strides = array<i32: 2, 1>} : memref<80x16xf32, #tpu.memory_space<vmem>>, vector<32x16xf32>
    %c9 = arith.constant 9 : index
    %c0_105 = arith.constant 0 : index
    %110 = tpu.strided_load %arg9[%c9, %c0_105] {strides = array<i32: 2, 1>} : memref<80x16xf32, #tpu.memory_space<vmem>>, vector<32x16xf32>
    %111 = arith.maximumf %109, %110 : vector<32x16xf32>
    %c10 = arith.constant 10 : index
    %c0_106 = arith.constant 0 : index
    %112 = tpu.strided_load %arg9[%c10, %c0_106] {strides = array<i32: 2, 1>} : memref<80x16xf32, #tpu.memory_space<vmem>>, vector<32x16xf32>
    %c11 = arith.constant 11 : index
    %c0_107 = arith.constant 0 : index
    %113 = tpu.strided_load %arg9[%c11, %c0_107] {strides = array<i32: 2, 1>} : memref<80x16xf32, #tpu.memory_space<vmem>>, vector<32x16xf32>
    %114 = arith.maximumf %112, %113 : vector<32x16xf32>
    %115 = tpu.iota {dimensions = array<i32: 0>} : vector<32x16xi32>
    %c0_i32 = arith.constant 0 : i32
    %116 = vector.broadcast %c0_i32 : i32 to vector<32x16xi32>
    %117 = arith.cmpi eq, %115, %116 : vector<32x16xi32>
    %c15_i32 = arith.constant 15 : i32
    %118 = vector.broadcast %c15_i32 : i32 to vector<32x16xi32>
    %119 = arith.cmpi eq, %115, %118 : vector<32x16xi32>
    %c16_i32 = arith.constant 16 : i32
    %120 = vector.broadcast %c16_i32 : i32 to vector<32x16xi32>
    %121 = arith.cmpi eq, %115, %120 : vector<32x16xi32>
    %122 = arith.ori %117, %121 : vector<32x16xi1>
    %c31_i32 = arith.constant 31 : i32
    %123 = vector.broadcast %c31_i32 : i32 to vector<32x16xi32>
    %124 = arith.cmpi eq, %115, %123 : vector<32x16xi32>
    %125 = arith.ori %119, %124 : vector<32x16xi1>
    %cst_108 = arith.constant 0.000000e+00 : f32
    %126 = vector.broadcast %cst_108 : f32 to vector<32x16xf32>
    %127 = arith.select %122, %126, %108 : vector<32x16xi1>, vector<32x16xf32>
    %cst_109 = arith.constant 0.000000e+00 : f32
    %128 = vector.broadcast %cst_109 : f32 to vector<32x16xf32>
    %129 = arith.select %125, %128, %114 : vector<32x16xi1>, vector<32x16xf32>
    %c0_110 = arith.constant 0 : index
    %c0_111 = arith.constant 0 : index
    %c0_112 = arith.constant 0 : index
    %130 = vector.load %arg3[%c0_110, %c0_111, %c0_112] : memref<3x16x32xf32, #tpu.memory_space<vmem>>, vector<1x16x32xf32>
    %131 = vector.shape_cast %130 : vector<1x16x32xf32> to vector<16x32xf32>
    %cst_113 = arith.constant dense<0.000000e+00> : vector<32x32xf32>
    %132 = tpu.matmul %127, %131, %cst_113 {dimension_numbers = #tpu.dot_dimension_numbers<[1], [0], [0], [1], [0, 0, 1, 1], [], []>} : vector<32x16xf32>, vector<16x32xf32>, vector<32x32xf32> -> vector<32x32xf32>
    %c1_114 = arith.constant 1 : index
    %c0_115 = arith.constant 0 : index
    %c0_116 = arith.constant 0 : index
    %133 = vector.load %arg3[%c1_114, %c0_115, %c0_116] : memref<3x16x32xf32, #tpu.memory_space<vmem>>, vector<1x16x32xf32>
    %134 = vector.shape_cast %133 : vector<1x16x32xf32> to vector<16x32xf32>
    %cst_117 = arith.constant dense<0.000000e+00> : vector<32x32xf32>
    %135 = tpu.matmul %111, %134, %cst_117 {dimension_numbers = #tpu.dot_dimension_numbers<[1], [0], [0], [1], [0, 0, 1, 1], [], []>} : vector<32x16xf32>, vector<16x32xf32>, vector<32x32xf32> -> vector<32x32xf32>
    %136 = arith.addf %132, %135 : vector<32x32xf32>
    %c2_118 = arith.constant 2 : index
    %c0_119 = arith.constant 0 : index
    %c0_120 = arith.constant 0 : index
    %137 = vector.load %arg3[%c2_118, %c0_119, %c0_120] : memref<3x16x32xf32, #tpu.memory_space<vmem>>, vector<1x16x32xf32>
    %138 = vector.shape_cast %137 : vector<1x16x32xf32> to vector<16x32xf32>
    %cst_121 = arith.constant dense<0.000000e+00> : vector<32x32xf32>
    %139 = tpu.matmul %129, %138, %cst_121 {dimension_numbers = #tpu.dot_dimension_numbers<[1], [0], [0], [1], [0, 0, 1, 1], [], []>} : vector<32x16xf32>, vector<16x32xf32>, vector<32x32xf32> -> vector<32x32xf32>
    %140 = arith.addf %136, %139 : vector<32x32xf32>
    %141 = vector.broadcast %105 : vector<1x32xf32> to vector<32x32xf32>
    %142 = arith.addf %140, %141 : vector<32x32xf32>
    %cst_122 = arith.constant 0.000000e+00 : f32
    %143 = vector.broadcast %cst_122 : f32 to vector<32x32xf32>
    %144 = arith.maximumf %142, %143 : vector<32x32xf32>
    %c8_123 = arith.constant 8 : index
    %c0_124 = arith.constant 0 : index
    %145 = vector.load %arg10[%c8_123, %c0_124] : memref<48x32xf32, #tpu.memory_space<vmem>>, vector<32x32xf32>
    tpu.vector_store %arg10[%c8_123, %c0_124], %144 {strides = array<i32>} : memref<48x32xf32, #tpu.memory_space<vmem>>, vector<32x32xf32>,
    %c2_125 = arith.constant 2 : index
    %c0_126 = arith.constant 0 : index
    %146 = vector.load %arg7[%c2_125, %c0_126] : memref<8x64xf32, #tpu.memory_space<vmem>>, vector<1x64xf32>
    %c6_127 = arith.constant 6 : index
    %c0_128 = arith.constant 0 : index
    %147 = tpu.strided_load %arg10[%c6_127, %c0_128] {strides = array<i32: 2, 1>} : memref<48x32xf32, #tpu.memory_space<vmem>>, vector<16x32xf32>
    %c7_129 = arith.constant 7 : index
    %c0_130 = arith.constant 0 : index
    %148 = tpu.strided_load %arg10[%c7_129, %c0_130] {strides = array<i32: 2, 1>} : memref<48x32xf32, #tpu.memory_space<vmem>>, vector<16x32xf32>
    %149 = arith.maximumf %147, %148 : vector<16x32xf32>
    %c8_131 = arith.constant 8 : index
    %c0_132 = arith.constant 0 : index
    %150 = tpu.strided_load %arg10[%c8_131, %c0_132] {strides = array<i32: 2, 1>} : memref<48x32xf32, #tpu.memory_space<vmem>>, vector<16x32xf32>
    %c9_133 = arith.constant 9 : index
    %c0_134 = arith.constant 0 : index
    %151 = tpu.strided_load %arg10[%c9_133, %c0_134] {strides = array<i32: 2, 1>} : memref<48x32xf32, #tpu.memory_space<vmem>>, vector<16x32xf32>
    %152 = arith.maximumf %150, %151 : vector<16x32xf32>
    %c10_135 = arith.constant 10 : index
    %c0_136 = arith.constant 0 : index
    %153 = tpu.strided_load %arg10[%c10_135, %c0_136] {strides = array<i32: 2, 1>} : memref<48x32xf32, #tpu.memory_space<vmem>>, vector<16x32xf32>
    %c11_137 = arith.constant 11 : index
    %c0_138 = arith.constant 0 : index
    %154 = tpu.strided_load %arg10[%c11_137, %c0_138] {strides = array<i32: 2, 1>} : memref<48x32xf32, #tpu.memory_space<vmem>>, vector<16x32xf32>
    %155 = arith.maximumf %153, %154 : vector<16x32xf32>
    %156 = tpu.iota {dimensions = array<i32: 0>} : vector<16x32xi32>
    %c0_i32_139 = arith.constant 0 : i32
    %157 = vector.broadcast %c0_i32_139 : i32 to vector<16x32xi32>
    %158 = arith.cmpi eq, %156, %157 : vector<16x32xi32>
    %c7_i32 = arith.constant 7 : i32
    %159 = vector.broadcast %c7_i32 : i32 to vector<16x32xi32>
    %160 = arith.cmpi eq, %156, %159 : vector<16x32xi32>
    %c8_i32 = arith.constant 8 : i32
    %161 = vector.broadcast %c8_i32 : i32 to vector<16x32xi32>
    %162 = arith.cmpi eq, %156, %161 : vector<16x32xi32>
    %163 = arith.ori %158, %162 : vector<16x32xi1>
    %c15_i32_140 = arith.constant 15 : i32
    %164 = vector.broadcast %c15_i32_140 : i32 to vector<16x32xi32>
    %165 = arith.cmpi eq, %156, %164 : vector<16x32xi32>
    %166 = arith.ori %160, %165 : vector<16x32xi1>
    %cst_141 = arith.constant 0.000000e+00 : f32
    %167 = vector.broadcast %cst_141 : f32 to vector<16x32xf32>
    %168 = arith.select %163, %167, %149 : vector<16x32xi1>, vector<16x32xf32>
    %cst_142 = arith.constant 0.000000e+00 : f32
    %169 = vector.broadcast %cst_142 : f32 to vector<16x32xf32>
    %170 = arith.select %166, %169, %155 : vector<16x32xi1>, vector<16x32xf32>
    %c0_143 = arith.constant 0 : index
    %c0_144 = arith.constant 0 : index
    %c0_145 = arith.constant 0 : index
    %171 = vector.load %arg4[%c0_143, %c0_144, %c0_145] : memref<3x32x64xf32, #tpu.memory_space<vmem>>, vector<1x32x64xf32>
    %172 = vector.shape_cast %171 : vector<1x32x64xf32> to vector<32x64xf32>
    %cst_146 = arith.constant dense<0.000000e+00> : vector<16x64xf32>
    %173 = tpu.matmul %168, %172, %cst_146 {dimension_numbers = #tpu.dot_dimension_numbers<[1], [0], [0], [1], [0, 0, 1, 1], [], []>} : vector<16x32xf32>, vector<32x64xf32>, vector<16x64xf32> -> vector<16x64xf32>
    %c1_147 = arith.constant 1 : index
    %c0_148 = arith.constant 0 : index
    %c0_149 = arith.constant 0 : index
    %174 = vector.load %arg4[%c1_147, %c0_148, %c0_149] : memref<3x32x64xf32, #tpu.memory_space<vmem>>, vector<1x32x64xf32>
    %175 = vector.shape_cast %174 : vector<1x32x64xf32> to vector<32x64xf32>
    %cst_150 = arith.constant dense<0.000000e+00> : vector<16x64xf32>
    %176 = tpu.matmul %152, %175, %cst_150 {dimension_numbers = #tpu.dot_dimension_numbers<[1], [0], [0], [1], [0, 0, 1, 1], [], []>} : vector<16x32xf32>, vector<32x64xf32>, vector<16x64xf32> -> vector<16x64xf32>
    %177 = arith.addf %173, %176 : vector<16x64xf32>
    %c2_151 = arith.constant 2 : index
    %c0_152 = arith.constant 0 : index
    %c0_153 = arith.constant 0 : index
    %178 = vector.load %arg4[%c2_151, %c0_152, %c0_153] : memref<3x32x64xf32, #tpu.memory_space<vmem>>, vector<1x32x64xf32>
    %179 = vector.shape_cast %178 : vector<1x32x64xf32> to vector<32x64xf32>
    %cst_154 = arith.constant dense<0.000000e+00> : vector<16x64xf32>
    %180 = tpu.matmul %170, %179, %cst_154 {dimension_numbers = #tpu.dot_dimension_numbers<[1], [0], [0], [1], [0, 0, 1, 1], [], []>} : vector<16x32xf32>, vector<32x64xf32>, vector<16x64xf32> -> vector<16x64xf32>
    %181 = arith.addf %177, %180 : vector<16x64xf32>
    %182 = vector.broadcast %146 : vector<1x64xf32> to vector<16x64xf32>
    %183 = arith.addf %181, %182 : vector<16x64xf32>
    %cst_155 = arith.constant 0.000000e+00 : f32
    %184 = vector.broadcast %cst_155 : f32 to vector<16x64xf32>
    %185 = arith.maximumf %183, %184 : vector<16x64xf32>
    %c8_156 = arith.constant 8 : index
    %c0_157 = arith.constant 0 : index
    %186 = vector.load %arg11[%c8_156, %c0_157] : memref<32x64xf32, #tpu.memory_space<vmem>>, vector<16x64xf32>
    tpu.vector_store %arg11[%c8_156, %c0_157], %185 {strides = array<i32>} : memref<32x64xf32, #tpu.memory_space<vmem>>, vector<16x64xf32>,
    %c3_158 = arith.constant 3 : index
    %c0_159 = arith.constant 0 : index
    %187 = vector.load %arg7[%c3_158, %c0_159] : memref<8x64xf32, #tpu.memory_space<vmem>>, vector<1x64xf32>
    %c6_160 = arith.constant 6 : index
    %c0_161 = arith.constant 0 : index
    %188 = tpu.strided_load %arg11[%c6_160, %c0_161] {strides = array<i32: 2, 1>} : memref<32x64xf32, #tpu.memory_space<vmem>>, vector<8x64xf32>
    %c7_162 = arith.constant 7 : index
    %c0_163 = arith.constant 0 : index
    %189 = tpu.strided_load %arg11[%c7_162, %c0_163] {strides = array<i32: 2, 1>} : memref<32x64xf32, #tpu.memory_space<vmem>>, vector<8x64xf32>
    %190 = arith.maximumf %188, %189 : vector<8x64xf32>
    %c8_164 = arith.constant 8 : index
    %c0_165 = arith.constant 0 : index
    %191 = tpu.strided_load %arg11[%c8_164, %c0_165] {strides = array<i32: 2, 1>} : memref<32x64xf32, #tpu.memory_space<vmem>>, vector<8x64xf32>
    %c9_166 = arith.constant 9 : index
    %c0_167 = arith.constant 0 : index
    %192 = tpu.strided_load %arg11[%c9_166, %c0_167] {strides = array<i32: 2, 1>} : memref<32x64xf32, #tpu.memory_space<vmem>>, vector<8x64xf32>
    %193 = arith.maximumf %191, %192 : vector<8x64xf32>
    %c10_168 = arith.constant 10 : index
    %c0_169 = arith.constant 0 : index
    %194 = tpu.strided_load %arg11[%c10_168, %c0_169] {strides = array<i32: 2, 1>} : memref<32x64xf32, #tpu.memory_space<vmem>>, vector<8x64xf32>
    %c11_170 = arith.constant 11 : index
    %c0_171 = arith.constant 0 : index
    %195 = tpu.strided_load %arg11[%c11_170, %c0_171] {strides = array<i32: 2, 1>} : memref<32x64xf32, #tpu.memory_space<vmem>>, vector<8x64xf32>
    %196 = arith.maximumf %194, %195 : vector<8x64xf32>
    %197 = tpu.iota {dimensions = array<i32: 0>} : vector<8x64xi32>
    %c0_i32_172 = arith.constant 0 : i32
    %198 = vector.broadcast %c0_i32_172 : i32 to vector<8x64xi32>
    %199 = arith.cmpi eq, %197, %198 : vector<8x64xi32>
    %c3_i32 = arith.constant 3 : i32
    %200 = vector.broadcast %c3_i32 : i32 to vector<8x64xi32>
    %201 = arith.cmpi eq, %197, %200 : vector<8x64xi32>
    %c4_i32 = arith.constant 4 : i32
    %202 = vector.broadcast %c4_i32 : i32 to vector<8x64xi32>
    %203 = arith.cmpi eq, %197, %202 : vector<8x64xi32>
    %204 = arith.ori %199, %203 : vector<8x64xi1>
    %c7_i32_173 = arith.constant 7 : i32
    %205 = vector.broadcast %c7_i32_173 : i32 to vector<8x64xi32>
    %206 = arith.cmpi eq, %197, %205 : vector<8x64xi32>
    %207 = arith.ori %201, %206 : vector<8x64xi1>
    %cst_174 = arith.constant 0.000000e+00 : f32
    %208 = vector.broadcast %cst_174 : f32 to vector<8x64xf32>
    %209 = arith.select %204, %208, %190 : vector<8x64xi1>, vector<8x64xf32>
    %cst_175 = arith.constant 0.000000e+00 : f32
    %210 = vector.broadcast %cst_175 : f32 to vector<8x64xf32>
    %211 = arith.select %207, %210, %196 : vector<8x64xi1>, vector<8x64xf32>
    %c0_176 = arith.constant 0 : index
    %c0_177 = arith.constant 0 : index
    %c0_178 = arith.constant 0 : index
    %212 = vector.load %arg5[%c0_176, %c0_177, %c0_178] : memref<3x64x64xf32, #tpu.memory_space<vmem>>, vector<1x64x64xf32>
    %213 = vector.shape_cast %212 : vector<1x64x64xf32> to vector<64x64xf32>
    %cst_179 = arith.constant dense<0.000000e+00> : vector<8x64xf32>
    %214 = tpu.matmul %209, %213, %cst_179 {dimension_numbers = #tpu.dot_dimension_numbers<[1], [0], [0], [1], [0, 0, 1, 1], [], []>} : vector<8x64xf32>, vector<64x64xf32>, vector<8x64xf32> -> vector<8x64xf32>
    %c1_180 = arith.constant 1 : index
    %c0_181 = arith.constant 0 : index
    %c0_182 = arith.constant 0 : index
    %215 = vector.load %arg5[%c1_180, %c0_181, %c0_182] : memref<3x64x64xf32, #tpu.memory_space<vmem>>, vector<1x64x64xf32>
    %216 = vector.shape_cast %215 : vector<1x64x64xf32> to vector<64x64xf32>
    %cst_183 = arith.constant dense<0.000000e+00> : vector<8x64xf32>
    %217 = tpu.matmul %193, %216, %cst_183 {dimension_numbers = #tpu.dot_dimension_numbers<[1], [0], [0], [1], [0, 0, 1, 1], [], []>} : vector<8x64xf32>, vector<64x64xf32>, vector<8x64xf32> -> vector<8x64xf32>
    %218 = arith.addf %214, %217 : vector<8x64xf32>
    %c2_184 = arith.constant 2 : index
    %c0_185 = arith.constant 0 : index
    %c0_186 = arith.constant 0 : index
    %219 = vector.load %arg5[%c2_184, %c0_185, %c0_186] : memref<3x64x64xf32, #tpu.memory_space<vmem>>, vector<1x64x64xf32>
    %220 = vector.shape_cast %219 : vector<1x64x64xf32> to vector<64x64xf32>
    %cst_187 = arith.constant dense<0.000000e+00> : vector<8x64xf32>
    %221 = tpu.matmul %211, %220, %cst_187 {dimension_numbers = #tpu.dot_dimension_numbers<[1], [0], [0], [1], [0, 0, 1, 1], [], []>} : vector<8x64xf32>, vector<64x64xf32>, vector<8x64xf32> -> vector<8x64xf32>
    %222 = arith.addf %218, %221 : vector<8x64xf32>
    %223 = vector.broadcast %187 : vector<1x64xf32> to vector<8x64xf32>
    %224 = arith.addf %222, %223 : vector<8x64xf32>
    %cst_188 = arith.constant 0.000000e+00 : f32
    %225 = vector.broadcast %cst_188 : f32 to vector<8x64xf32>
    %226 = arith.maximumf %224, %225 : vector<8x64xf32>
    %c8_189 = arith.constant 8 : index
    %c0_190 = arith.constant 0 : index
    %227 = vector.load %arg12[%c8_189, %c0_190] : memref<24x64xf32, #tpu.memory_space<vmem>>, vector<8x64xf32>
    tpu.vector_store %arg12[%c8_189, %c0_190], %226 {strides = array<i32>} : memref<24x64xf32, #tpu.memory_space<vmem>>, vector<8x64xf32>,
    %c4_191 = arith.constant 4 : index
    %c0_192 = arith.constant 0 : index
    %228 = vector.load %arg7[%c4_191, %c0_192] : memref<8x64xf32, #tpu.memory_space<vmem>>, vector<1x64xf32>
    %c6_193 = arith.constant 6 : index
    %c0_194 = arith.constant 0 : index
    %229 = tpu.strided_load %arg12[%c6_193, %c0_194] {strides = array<i32: 2, 1>} : memref<24x64xf32, #tpu.memory_space<vmem>>, vector<4x64xf32>
    %c7_195 = arith.constant 7 : index
    %c0_196 = arith.constant 0 : index
    %230 = tpu.strided_load %arg12[%c7_195, %c0_196] {strides = array<i32: 2, 1>} : memref<24x64xf32, #tpu.memory_space<vmem>>, vector<4x64xf32>
    %231 = arith.maximumf %229, %230 : vector<4x64xf32>
    %c8_197 = arith.constant 8 : index
    %c0_198 = arith.constant 0 : index
    %232 = tpu.strided_load %arg12[%c8_197, %c0_198] {strides = array<i32: 2, 1>} : memref<24x64xf32, #tpu.memory_space<vmem>>, vector<4x64xf32>
    %c9_199 = arith.constant 9 : index
    %c0_200 = arith.constant 0 : index
    %233 = tpu.strided_load %arg12[%c9_199, %c0_200] {strides = array<i32: 2, 1>} : memref<24x64xf32, #tpu.memory_space<vmem>>, vector<4x64xf32>
    %234 = arith.maximumf %232, %233 : vector<4x64xf32>
    %c10_201 = arith.constant 10 : index
    %c0_202 = arith.constant 0 : index
    %235 = tpu.strided_load %arg12[%c10_201, %c0_202] {strides = array<i32: 2, 1>} : memref<24x64xf32, #tpu.memory_space<vmem>>, vector<4x64xf32>
    %c11_203 = arith.constant 11 : index
    %c0_204 = arith.constant 0 : index
    %236 = tpu.strided_load %arg12[%c11_203, %c0_204] {strides = array<i32: 2, 1>} : memref<24x64xf32, #tpu.memory_space<vmem>>, vector<4x64xf32>
    %237 = arith.maximumf %235, %236 : vector<4x64xf32>
    %238 = tpu.iota {dimensions = array<i32: 0>} : vector<4x64xi32>
    %c0_i32_205 = arith.constant 0 : i32
    %239 = vector.broadcast %c0_i32_205 : i32 to vector<4x64xi32>
    %240 = arith.cmpi eq, %238, %239 : vector<4x64xi32>
    %c1_i32 = arith.constant 1 : i32
    %241 = vector.broadcast %c1_i32 : i32 to vector<4x64xi32>
    %242 = arith.cmpi eq, %238, %241 : vector<4x64xi32>
    %c2_i32 = arith.constant 2 : i32
    %243 = vector.broadcast %c2_i32 : i32 to vector<4x64xi32>
    %244 = arith.cmpi eq, %238, %243 : vector<4x64xi32>
    %245 = arith.ori %240, %244 : vector<4x64xi1>
    %c3_i32_206 = arith.constant 3 : i32
    %246 = vector.broadcast %c3_i32_206 : i32 to vector<4x64xi32>
    %247 = arith.cmpi eq, %238, %246 : vector<4x64xi32>
    %248 = arith.ori %242, %247 : vector<4x64xi1>
    %cst_207 = arith.constant 0.000000e+00 : f32
    %249 = vector.broadcast %cst_207 : f32 to vector<4x64xf32>
    %250 = arith.select %245, %249, %231 : vector<4x64xi1>, vector<4x64xf32>
    %cst_208 = arith.constant 0.000000e+00 : f32
    %251 = vector.broadcast %cst_208 : f32 to vector<4x64xf32>
    %252 = arith.select %248, %251, %237 : vector<4x64xi1>, vector<4x64xf32>
    %c0_209 = arith.constant 0 : index
    %c0_210 = arith.constant 0 : index
    %c0_211 = arith.constant 0 : index
    %253 = vector.load %arg6[%c0_209, %c0_210, %c0_211] : memref<3x64x64xf32, #tpu.memory_space<vmem>>, vector<1x64x64xf32>
    %254 = vector.shape_cast %253 : vector<1x64x64xf32> to vector<64x64xf32>
    %cst_212 = arith.constant dense<0.000000e+00> : vector<4x64xf32>
    %255 = tpu.matmul %250, %254, %cst_212 {dimension_numbers = #tpu.dot_dimension_numbers<[1], [0], [0], [1], [0, 0, 1, 1], [], []>} : vector<4x64xf32>, vector<64x64xf32>, vector<4x64xf32> -> vector<4x64xf32>
    %c1_213 = arith.constant 1 : index
    %c0_214 = arith.constant 0 : index
    %c0_215 = arith.constant 0 : index
    %256 = vector.load %arg6[%c1_213, %c0_214, %c0_215] : memref<3x64x64xf32, #tpu.memory_space<vmem>>, vector<1x64x64xf32>
    %257 = vector.shape_cast %256 : vector<1x64x64xf32> to vector<64x64xf32>
    %cst_216 = arith.constant dense<0.000000e+00> : vector<4x64xf32>
    %258 = tpu.matmul %234, %257, %cst_216 {dimension_numbers = #tpu.dot_dimension_numbers<[1], [0], [0], [1], [0, 0, 1, 1], [], []>} : vector<4x64xf32>, vector<64x64xf32>, vector<4x64xf32> -> vector<4x64xf32>
    %259 = arith.addf %255, %258 : vector<4x64xf32>
    %c2_217 = arith.constant 2 : index
    %c0_218 = arith.constant 0 : index
    %c0_219 = arith.constant 0 : index
    %260 = vector.load %arg6[%c2_217, %c0_218, %c0_219] : memref<3x64x64xf32, #tpu.memory_space<vmem>>, vector<1x64x64xf32>
    %261 = vector.shape_cast %260 : vector<1x64x64xf32> to vector<64x64xf32>
    %cst_220 = arith.constant dense<0.000000e+00> : vector<4x64xf32>
    %262 = tpu.matmul %252, %261, %cst_220 {dimension_numbers = #tpu.dot_dimension_numbers<[1], [0], [0], [1], [0, 0, 1, 1], [], []>} : vector<4x64xf32>, vector<64x64xf32>, vector<4x64xf32> -> vector<4x64xf32>
    %263 = arith.addf %259, %262 : vector<4x64xf32>
    %264 = vector.broadcast %228 : vector<1x64xf32> to vector<4x64xf32>
    %265 = arith.addf %263, %264 : vector<4x64xf32>
    %cst_221 = arith.constant 0.000000e+00 : f32
    %266 = vector.broadcast %cst_221 : f32 to vector<4x64xf32>
    %267 = arith.maximumf %265, %266 : vector<4x64xf32>
    %c0_222 = arith.constant 0 : index
    %c0_223 = arith.constant 0 : index
    %c0_224 = arith.constant 0 : index
    %268 = vector.load %arg8[%c0_222, %c0_223, %c0_224] : memref<1x4x64xf32, #tpu.memory_space<vmem>>, vector<1x4x64xf32>
    %269 = vector.shape_cast %268 : vector<1x4x64xf32> to vector<4x64xf32>
    %270 = vector.shape_cast %267 : vector<4x64xf32> to vector<1x4x64xf32>
    tpu.vector_store %arg8[%c0_222, %c0_223, %c0_224], %270 {strides = array<i32>} : memref<1x4x64xf32, #tpu.memory_space<vmem>>, vector<1x4x64xf32>,
    return
  }
  func.func @transform_0(%arg0: i32) -> (i32, i32, i32) {
    %c0_i32 = arith.constant 0 : i32
    %c0_i32_0 = arith.constant 0 : i32
    %c0_i32_1 = arith.constant 0 : i32
    return %arg0, %c0_i32, %c0_i32_0 : i32, i32, i32
  }
  func.func @transform_1(%arg0: i32) -> (i32, i32, i32) {
    %c0_i32 = arith.constant 0 : i32
    %c0_i32_0 = arith.constant 0 : i32
    %c0_i32_1 = arith.constant 0 : i32
    %c0_i32_2 = arith.constant 0 : i32
    return %c0_i32, %c0_i32_0, %c0_i32_1 : i32, i32, i32
  }
  func.func @transform_2(%arg0: i32) -> (i32, i32, i32) {
    %c0_i32 = arith.constant 0 : i32
    %c0_i32_0 = arith.constant 0 : i32
    %c0_i32_1 = arith.constant 0 : i32
    %c0_i32_2 = arith.constant 0 : i32
    return %c0_i32, %c0_i32_0, %c0_i32_1 : i32, i32, i32
  }
  func.func @transform_3(%arg0: i32) -> (i32, i32, i32) {
    %c0_i32 = arith.constant 0 : i32
    %c0_i32_0 = arith.constant 0 : i32
    %c0_i32_1 = arith.constant 0 : i32
    %c0_i32_2 = arith.constant 0 : i32
    return %c0_i32, %c0_i32_0, %c0_i32_1 : i32, i32, i32
  }
  func.func @transform_4(%arg0: i32) -> (i32, i32, i32) {
    %c0_i32 = arith.constant 0 : i32
    %c0_i32_0 = arith.constant 0 : i32
    %c0_i32_1 = arith.constant 0 : i32
    %c0_i32_2 = arith.constant 0 : i32
    return %c0_i32, %c0_i32_0, %c0_i32_1 : i32, i32, i32
  }
  func.func @transform_5(%arg0: i32) -> (i32, i32, i32) {
    %c0_i32 = arith.constant 0 : i32
    %c0_i32_0 = arith.constant 0 : i32
    %c0_i32_1 = arith.constant 0 : i32
    %c0_i32_2 = arith.constant 0 : i32
    return %c0_i32, %c0_i32_0, %c0_i32_1 : i32, i32, i32
  }
  func.func @transform_6(%arg0: i32) -> (i32, i32) {
    %c0_i32 = arith.constant 0 : i32
    %c0_i32_0 = arith.constant 0 : i32
    %c0_i32_1 = arith.constant 0 : i32
    return %c0_i32, %c0_i32_0 : i32, i32
  }
  func.func @transform_7(%arg0: i32) -> (i32, i32, i32) {
    %c0_i32 = arith.constant 0 : i32
    %c0_i32_0 = arith.constant 0 : i32
    %c0_i32_1 = arith.constant 0 : i32
    return %arg0, %c0_i32, %c0_i32_0 : i32, i32, i32
  }
}

</mosaic_0001>

<bundles_post_ra>
// kernel: tpu_custom_call.1
= control target key start
LH: loop header
LB: loop body
LE: loop exit
PB: predicated region body
PF: predicated region fallthrough
CT: control target
= control target key end

     0   :  { %12 = vsyncpa [#allocation7], 0  ;;  %s2319_s0 = inlined_call_operand.vmem [shape: f32[1,140,16], index: 0, kind: input, shape index: {}]   ;;  %s2320_s1 = inlined_call_operand.vmem [shape: f32[8,16,16], index: 1, kind: input, shape index: {}]   ;;  %s2321_s2 = inlined_call_operand.vmem [shape: f32[3,16,32], index: 2, kind: input, shape index: {}]   ;;  %s2322_s3 = inlined_call_operand.hbm [shape: f32[3,32,64], index: 3, kind: input, shape index: {}]   ;;  %s2323_s4 = inlined_call_operand.hbm [shape: f32[3,64,64], index: 4, kind: input, shape index: {}]   ;;  %s2324_s5 = inlined_call_operand.hbm [shape: f32[3,64,64], index: 5, kind: input, shape index: {}]   ;;  %s2325_s6 = inlined_call_operand.hbm [shape: f32[8,64], index: 6, kind: input, shape index: {}]   ;;  %s2326_s7 = inlined_call_operand.hbm [shape: f32[1,4,64], index: 7, kind: output, shape index: {}]  }
   0x1   :  { %13 = vsyncpa [#allocation10], 0 }
   0x2   :  { %14 = vsyncpa [#allocation13], 0 }
   0x3   :  { %15 = vsyncpa [#allocation8], 0  ;;  %s39_s26 = sshll.u32 %s2323_s4, 4  ;;  %s1847_s27 = smov [#allocation9]   ;;  %s40_s26 = int_to_ptr.hbm [resolvable:$true] %s39_s26 }
   0x4   :  { %s41_s28 = sshll.u32 %s1847_s27, 4  ;;  %s26_s8 = sshll.u32 %s2322_s3, 4  ;;  %s42_s28 = int_to_ptr.vmem [resolvable:$true] %s41_s28  ;;  %s27_s8 = int_to_ptr.hbm [resolvable:$true] %s26_s8 }
   0x5   :  { %s1848_s9 = smov 128   ;;  %s1849_s10 = smov 8  }
   0x6   :  { %47 = dma.hbm_to_vmem [thread:$0]  %s40_s26, 3072, %s42_s28, [#allocation10], %s1848_s9, %s1848_s9, %s1849_s10  }
   0x7   :  { %s1850_s11 = smov [#allocation6]   ;;  %s52_s15 = sshll.u32 %s2324_s5, 4  ;;  %s53_s15 = int_to_ptr.hbm [resolvable:$true] %s52_s15 }
   0x8   :  { %s28_s12 = sshll.u32 %s1850_s11, 4  ;;  %s66_s17 = sshll.u32 %s2325_s6, 4  ;;  %s29_s12 = int_to_ptr.vmem [resolvable:$true] %s28_s12  ;;  %s67_s17 = int_to_ptr.hbm [resolvable:$true] %s66_s17 }
   0x9   :  { %34 = dma.hbm_to_vmem [thread:$0]  %s27_s8, 1536, %s29_s12, [#allocation7], %s1848_s9, %s1848_s9, %s1849_s10  }
   0xa   :  { %s1851_s18 = smov [#allocation11]   ;;  %s1852_s3 = smov [#allocation12]  }
   0xb   :  { %s54_s19 = sshll.u32 %s1851_s18, 4  ;;  %s68_s20 = sshll.u32 %s1852_s3, 4  ;;  %s55_s19 = int_to_ptr.vmem [resolvable:$true] %s54_s19  ;;  %s69_s20 = int_to_ptr.vmem [resolvable:$true] %s68_s20 }
   0xc   :  { %60 = dma.hbm_to_vmem [thread:$0]  %s53_s15, 3072, %s55_s19, [#allocation10], %s1848_s9, %s1848_s9, %s1849_s10  }
   0xd   :  { %71 = dma.hbm_to_vmem [thread:$0]  %s67_s17, 128, %s69_s20, [#allocation13]  }
   0xe   :  { %1839 = dma.done.wait [#allocation7], 1536  }
   0xf   :  { %1840 = vsyncadd [#allocation7], 4294965760 }
  0x10   :  { %1841 = dma.done.wait [#allocation10], 6144  }
  0x11   :  { %1842 = vsyncadd [#allocation10], 4294961152 }
  0x12   :  { %1843 = dma.done.wait [#allocation13], 128  }
  0x13   :  { %1844 = vsyncadd [#allocation13], 4294967168  ;;  %v1588_v0 = vld [vmem:[%s2320_s1 + $0x18] sm:$0xff]  ;;  %v1598_v1 = vld [vmem:[%s2320_s1 + $0x28] sm:$0xff]  ;;  %vm102_vm0 = vcmask 130048   ;;  %vm1164_vm5 = vcmask 261120  }
  0x14   :  { %v1587_v2 = vld [vmem:[%s2320_s1 + $0x10] sm:$0xff]  ;;  %129 = vmatpush.msra.mxu0 %v1588_v0  ;;  %218 = vmatpush.msra.mxu2 %v1598_v1  ;;  %v94_v3 = vld [vmem:[%s2320_s1 + $0x8] sm:$0xff]  ;;  %v1597_v4 = vld [vmem:[%s2320_s1 + $0x20] sm:$0xff]  ;;  %vm1320_vm8 = vcmask 523264   ;;  %s1575_s26 = sshll.u32 %s2326_s7, 4  ;;  %s1576_s26 = int_to_ptr.hbm [resolvable:$true] %s1575_s26 }
  0x15   :  { %v1604_v5 = vld [vmem:[%s2320_s1 + $0x38] sm:$0xff]  ;;  %170 = vmatpush.msra.mxu1 %v94_v3  ;;  %v95_v6 = vld [vmem:[%s2319_s0 + $0x1] sm:$0xff]  ;;  %v1603_v10 = vld [vmem:[%s2320_s1 + $0x30] sm:$0xff] }
  0x16   :  { %270 = vmatpush.msra.mxu3 %v1604_v5  ;;  %v185_v7 = vld [vmem:[%s2319_s0 + $0x2] sm:$0xff]  ;;  %130 = vmatpush.msra.mxu0 %v1587_v2  ;;  %v1628_v14 = vld [vmem:[%s2320_s1 + $0x78] sm:$0xff]  ;;  %v1627_v18 = vld [vmem:[%s2320_s1 + $0x70] sm:$0xff] }
  0x17   :  { %v1933_v8 = vld [vmem:[%s2320_s1 + $0x68] sm:$0xff]  ;;  %219 = vmatpush.msra.mxu2 %v1597_v4  ;;  %v93_v9 = vld [vmem:[%s2320_s1] sm:$0xff]  ;;  %1589 = vmatmul.msk.f32.vlgmr.msra.gmra.mxu0 %vm102_vm0, %v95_v6  ;;  %v1616_v15 = vld [vmem:[%s2320_s1 + $0x58] sm:$0xff] }
  0x18   :  { %v89_v11 = vld [vmem:[%s2319_s0] sm:$0xff]  ;;  %1599 = vmatmul.msk.f32.vlgmr.msra.gmra.mxu2 %vm102_vm0, %v185_v7  ;;  %v1610_v13 = vld [vmem:[%s2320_s1 + $0x48] sm:$0xff]  ;;  %171 = vmatpush.msra.mxu1 %v93_v9  ;;  %v1615_v21 = vld [vmem:[%s2320_s1 + $0x50] sm:$0xff] }
  0x19   :  { %v237_v12 = vld [vmem:[%s2319_s0 + $0x3] sm:$0xff]  ;;  %426 = vmatpush.msrb.mxu2 %v1933_v8  ;;  %271 = vmatpush.msra.mxu3 %v1603_v10  ;;  %v238_v23 = vld [vmem:[%s2319_s0 + $0xb] sm:$0xff]  ;;  %v239_v27 = vld [vmem:[%s2319_s0 + $0x13] sm:$0xff] }
  0x1a   :  { %1593 = vmatmul.msk.f32.vlgmr.msra.gmra.mxu1 %vm102_vm0, %v89_v11  ;;  %1605 = vmatmul.msk.f32.vlgmr.msra.gmra.mxu3 %vm102_vm0, %v237_v12  ;;  %v1621_v16 = vld [vmem:[%s2320_s1 + $0x60] sm:$0xff]  ;;  %v96_v19 = vld [vmem:[%s2319_s0 + $0x9] sm:$0xff]  ;;  %v97_v24 = vld [vmem:[%s2319_s0 + $0x11] sm:$0xff] }
  0x1b   :  { %322 = vmatpush.msrb.mxu0 %v1610_v13  ;;  %478 = vmatpush.msrb.mxu3 %v1628_v14  ;;  %v1609_v17 = vld [vmem:[%s2320_s1 + $0x40] sm:$0xff]  ;;  %v186_v20 = vld [vmem:[%s2319_s0 + $0xa] sm:$0xff]  ;;  %v187_v25 = vld [vmem:[%s2319_s0 + $0x12] sm:$0xff] }
  0x1c   :  { %374 = vmatpush.msrb.mxu1 %v1616_v15  ;;  %427 = vmatpush.msrb.mxu2 %v1621_v16  ;;  %v90_v22 = vld [vmem:[%s2319_s0 + $0x8] sm:$0xff]  ;;  %v91_v26 = vld [vmem:[%s2319_s0 + $0x10] sm:$0xff]  ;;  %v98_v28 = vld [vmem:[%s2319_s0 + $0x19] sm:$0xff] }
  0x1d   :  { %323 = vmatpush.msrb.mxu0 %v1609_v17  ;;  %479 = vmatpush.msrb.mxu3 %v1627_v18  ;;  %v188_v29 = vld [vmem:[%s2319_s0 + $0x1a] sm:$0xff]  ;;  %v289_v32 = vld [vmem:[%s2319_s0 + $0x23] sm:$0xff]  ;;  %v290_v36 = vld [vmem:[%s2319_s0 + $0x2b] sm:$0xff] }
  0x1e   :  { %375 = vmatpush.msrb.mxu1 %v1615_v21  ;;  %636 = vmatpush.msra.mxu2 %v1598_v1  ;;  %v92_v30 = vld [vmem:[%s2319_s0 + $0x18] sm:$0xff]  ;;  %v393_v33 = vld [vmem:[%s2319_s0 + $0x25] sm:$0xff]  ;;  %v394_v37 = vld [vmem:[%s2319_s0 + $0x2d] sm:$0xff] }
  0x1f   :  { %548 = vmatpush.msra.mxu0 %v1588_v0  ;;  %687 = vmatpush.msra.mxu3 %v1604_v5  ;;  %v240_v31 = vld [vmem:[%s2319_s0 + $0x1b] sm:$0xff]  ;;  %v341_v34 = vld [vmem:[%s2319_s0 + $0x24] sm:$0xff]  ;;  %v342_v38 = vld [vmem:[%s2319_s0 + $0x2c] sm:$0xff] }
  0x20   :  { %1590 = vmatmul.msk.f32.gmra.mxu0 %vm102_vm0, %v96_v19  ;;  %1600 = vmatmul.msk.f32.gmra.mxu2 %vm102_vm0, %v186_v20  ;;  %v445_v35 = vld [vmem:[%s2319_s0 + $0x26] sm:$0xff]  ;;  %v446_v39 = vld [vmem:[%s2319_s0 + $0x2e] sm:$0xff]  ;;  %v447_v43 = vld [vmem:[%s2319_s0 + $0x36] sm:$0xff] }
  0x21   :  { %589 = vmatpush.msra.mxu1 %v94_v3  ;;  %637 = vmatpush.msra.mxu2 %v1597_v4  ;;  %v291_v40 = vld [vmem:[%s2319_s0 + $0x33] sm:$0xff]  ;;  %v292_v44 = vld [vmem:[%s2319_s0 + $0x3b] sm:$0xff]  ;;  %v516_v48 = vld [vmem:[%s2319_s0 + $0x47] sm:$0xff] }
  0x22   :  { %1594 = vmatmul.msk.f32.gmra.mxu1 %vm102_vm0, %v90_v22  ;;  %1606 = vmatmul.msk.f32.gmra.mxu3 %vm102_vm0, %v238_v23  ;;  %v395_v41 = vld [vmem:[%s2319_s0 + $0x35] sm:$0xff]  ;;  %v396_v45 = vld [vmem:[%s2319_s0 + $0x3d] sm:$0xff]  ;;  %v604_v49 = vld [vmem:[%s2319_s0 + $0x48] sm:$0xff] }
  0x23   :  { %549 = vmatpush.msra.mxu0 %v1587_v2  ;;  %688 = vmatpush.msra.mxu3 %v1603_v10  ;;  %v343_v42 = vld [vmem:[%s2319_s0 + $0x34] sm:$0xff]  ;;  %v344_v46 = vld [vmem:[%s2319_s0 + $0x3c] sm:$0xff]  ;;  %v510_v50 = vld [vmem:[%s2319_s0 + $0x46] sm:$0xff] }
  0x24   :  { %590 = vmatpush.msra.mxu1 %v93_v9  ;;  %v448_v47 = vld [vmem:[%s2319_s0 + $0x3e] sm:$0xff]  ;;  %v655_v51 = vld [vmem:[%s2319_s0 + $0x49] sm:$0xff]  ;;  %v656_v55 = vld [vmem:[%s2319_s0 + $0x51] sm:$0xff] }
  0x25   :  { %v517_v52 = vld [vmem:[%s2319_s0 + $0x4f] sm:$0xff]  ;;  %v518_v56 = vld [vmem:[%s2319_s0 + $0x57] sm:$0xff]  ;;  %v519_v60 = vld [vmem:[%s2319_s0 + $0x5f] sm:$0xff] }
  0x26   :  { %v605_v53 = vld [vmem:[%s2319_s0 + $0x50] sm:$0xff]  ;;  %v606_v57 = vld [vmem:[%s2319_s0 + $0x58] sm:$0xff]  ;;  %v607_v61 = vld [vmem:[%s2319_s0 + $0x60] sm:$0xff] }
  0x27   :  { %v511_v54 = vld [vmem:[%s2319_s0 + $0x4e] sm:$0xff]  ;;  %v512_v58 = vld [vmem:[%s2319_s0 + $0x56] sm:$0xff]  ;;  %v513_v62 = vld [vmem:[%s2319_s0 + $0x5e] sm:$0xff] }
  0x28   :  { %1591 = vmatmul.msk.f32.gmra.mxu0 %vm102_vm0, %v97_v24  ;;  %1601 = vmatmul.msk.f32.gmra.mxu2 %vm102_vm0, %v187_v25  ;;  %v657_v59 = vld [vmem:[%s2319_s0 + $0x59] sm:$0xff]  ;;  %v658_v63 = vld [vmem:[%s2319_s0 + $0x61] sm:$0xff]  ;;  %v706_v0 = vld [vmem:[%s2319_s0 + $0x69] sm:$0xff] }
  0x29   :  { %v808_v1 = vld [vmem:[%s2319_s0 + $0x6b] sm:$0xff]  ;;  %v809_v5 = vld [vmem:[%s2319_s0 + $0x73] sm:$0xff]  ;;  %v810_v9 = vld [vmem:[%s2319_s0 + $0x7b] sm:$0xff] }
  0x2a   :  { %1595 = vmatmul.msk.f32.gmra.mxu1 %vm102_vm0, %v91_v26  ;;  %1607 = vmatmul.msk.f32.gmra.mxu3 %vm102_vm0, %v239_v27  ;;  %v757_v2 = vld [vmem:[%s2319_s0 + $0x6a] sm:$0xff]  ;;  %v758_v6 = vld [vmem:[%s2319_s0 + $0x72] sm:$0xff]  ;;  %v759_v10 = vld [vmem:[%s2319_s0 + $0x7a] sm:$0xff] }
  0x2b   :  { %v859_v3 = vld [vmem:[%s2319_s0 + $0x6c] sm:$0xff]  ;;  %v860_v7 = vld [vmem:[%s2319_s0 + $0x74] sm:$0xff]  ;;  %v861_v11 = vld [vmem:[%s2319_s0 + $0x7c] sm:$0xff] }
  0x2c   :  { %v707_v4 = vld [vmem:[%s2319_s0 + $0x71] sm:$0xff]  ;;  %v709_v12 = vld [vmem:[%s2319_s0 + $0x81] sm:$0xff] }
  0x30   :  { %1592 = vmatmul.msk.f32.gmra.mxu0 %vm102_vm0, %v98_v28  ;;  %1602 = vmatmul.msk.f32.gmra.mxu2 %vm102_vm0, %v188_v29 }
  0x32   :  { %1596 = vmatmul.msk.f32.gmra.mxu1 %vm102_vm0, %v92_v30  ;;  %1608 = vmatmul.msk.f32.gmra.mxu3 %vm102_vm0, %v240_v31 }
  0x38   :  { %1611 = vmatmul.msk.f32.vlgmr.msrb.gmra.mxu0 %vm102_vm0, %v289_v32  ;;  %1623 = vmatmul.msk.f32.vlgmr.msrb.gmra.mxu2 %vm102_vm0, %v393_v33  ;;  %v1680_v33 = vld [vmem:[%s2321_s2 + $0x18] sm:$0xff] }
  0x39   :  { %840 = vmatpush.msrb.mxu2 %v1933_v8  ;;  %738 = vmatpush.msrb.mxu0 %v1610_v13  ;;  %v708_v8 = vld [vmem:[%s2319_s0 + $0x79] sm:$0xff]  ;;  %v811_v13 = vld [vmem:[%s2319_s0 + $0x83] sm:$0xff] }
  0x3a   :  { %1617 = vmatmul.msk.f32.vlgmr.msrb.gmra.mxu1 %vm102_vm0, %v341_v34  ;;  %1629 = vmatmul.msk.f32.vlgmr.msrb.gmra.mxu3 %vm102_vm0, %v445_v35  ;;  %v1021_v35 = vld [vmem:[%s2321_s2 + $0x8] sm:$0xff] }
  0x3b   :  { %789 = vmatpush.msrb.mxu1 %v1616_v15  ;;  %891 = vmatpush.msrb.mxu3 %v1628_v14  ;;  %v760_v14 = vld [vmem:[%s2319_s0 + $0x82] sm:$0xff] }
  0x3c   :  { %841 = vmatpush.msrb.mxu2 %v1621_v16  ;;  %739 = vmatpush.msrb.mxu0 %v1609_v17  ;;  %v862_v15 = vld [vmem:[%s2319_s0 + $0x84] sm:$0xff] }
  0x3d   :  { %790 = vmatpush.msrb.mxu1 %v1615_v21  ;;  %892 = vmatpush.msrb.mxu3 %v1627_v18 }
  0x40   :  { %1612 = vmatmul.msk.f32.gmra.mxu0 %vm102_vm0, %v290_v36  ;;  %1624 = vmatmul.msk.f32.gmra.mxu2 %vm102_vm0, %v394_v37  ;;  %v1679_v37 = vld [vmem:[%s2321_s2 + $0x10] sm:$0xff] }
  0x42   :  { %1618 = vmatmul.msk.f32.gmra.mxu1 %vm102_vm0, %v342_v38  ;;  %1630 = vmatmul.msk.f32.gmra.mxu3 %vm102_vm0, %v446_v39 }
  0x48   :  { %1613 = vmatmul.msk.f32.gmra.mxu0 %vm102_vm0, %v291_v40  ;;  %1625 = vmatmul.msk.f32.gmra.mxu2 %vm102_vm0, %v395_v41  ;;  %v1020_v41 = vld [vmem:[%s2321_s2] sm:$0xff] }
  0x4a   :  { %1619 = vmatmul.msk.f32.gmra.mxu1 %vm102_vm0, %v343_v42  ;;  %1631 = vmatmul.msk.f32.gmra.mxu3 %vm102_vm0, %v447_v43 }
  0x50   :  { %1614 = vmatmul.msk.f32.gmra.mxu0 %vm102_vm0, %v292_v44  ;;  %1626 = vmatmul.msk.f32.gmra.mxu2 %vm102_vm0, %v396_v45 }
  0x52   :  { %1620 = vmatmul.msk.f32.gmra.mxu1 %vm102_vm0, %v344_v46  ;;  %1632 = vmatmul.msk.f32.gmra.mxu3 %vm102_vm0, %v448_v47 }
  0x58   :  { %1635 = vmatmul.msk.f32.vlgmr.msra.gmra.mxu0 %vm102_vm0, %v516_v48  ;;  %1645 = vmatmul.msk.f32.vlgmr.msra.gmra.mxu2 %vm102_vm0, %v604_v49  ;;  %v1690_v48 = vld [vmem:[%s2321_s2 + $0x28] sm:$0xff] }
  0x59   :  { %1051 = vmatpush.msra.mxu0 %v1680_v33  ;;  %1136 = vmatpush.msra.mxu2 %v1690_v48 }
  0x5a   :  { %1639 = vmatmul.msk.f32.vlgmr.msra.gmra.mxu1 %vm102_vm0, %v510_v50  ;;  %1651 = vmatmul.msk.f32.vlgmr.msra.gmra.mxu3 %vm102_vm0, %v655_v51  ;;  %v2229_v50 = vld [vmem:[#allocation12] ss:$0 sm:$0xff] }
  0x5b   :  { %1092 = vmatpush.msra.mxu1 %v1021_v35  ;;  %1052 = vmatpush.msra.mxu0 %v1679_v37 }
  0x5d   :  { %1093 = vmatpush.msra.mxu1 %v1020_v41 }
  0x60   :  { %1636 = vmatmul.msk.f32.gmra.mxu0 %vm102_vm0, %v517_v52  ;;  %1646 = vmatmul.msk.f32.gmra.mxu2 %vm102_vm0, %v605_v53 }
  0x62   :  { %1640 = vmatmul.msk.f32.gmra.mxu1 %vm102_vm0, %v511_v54  ;;  %1652 = vmatmul.msk.f32.gmra.mxu3 %vm102_vm0, %v656_v55  ;;  %v1689_v54 = vld [vmem:[%s2321_s2 + $0x20] sm:$0xff]  ;;  %s1853_s2 = smov [#allocation14]  }
  0x63   :  { %1137 = vmatpush.msra.mxu2 %v1689_v54  ;;  %s1573_s23 = sshll.u32 %s1853_s2, 4  ;;  %s1574_s23 = int_to_ptr.vmem [resolvable:$true] %s1573_s23 }
  0x68   :  { %1637 = vmatmul.msk.f32.gmra.mxu0 %vm102_vm0, %v518_v56  ;;  %1647 = vmatmul.msk.f32.gmra.mxu2 %vm102_vm0, %v606_v57 }
  0x6a   :  { %1641 = vmatmul.msk.f32.gmra.mxu1 %vm102_vm0, %v512_v58  ;;  %1653 = vmatmul.msk.f32.gmra.mxu3 %vm102_vm0, %v657_v59 }
  0x70   :  { %1638 = vmatmul.msk.f32.gmra.mxu0 %vm102_vm0, %v519_v60  ;;  %1648 = vmatmul.msk.f32.gmra.mxu2 %vm102_vm0, %v607_v61 }
  0x72   :  { %1642 = vmatmul.msk.f32.gmra.mxu1 %vm102_vm0, %v513_v62  ;;  %1654 = vmatmul.msk.f32.gmra.mxu3 %vm102_vm0, %v658_v63 }
  0x78   :  { %1657 = vmatmul.msk.f32.vlgmr.msrb.gmra.mxu0 %vm102_vm0, %v706_v0  ;;  %1669 = vmatmul.msk.f32.vlgmr.msrb.gmra.mxu2 %vm102_vm0, %v808_v1 }
  0x7a   :  { %1663 = vmatmul.msk.f32.vlgmr.msrb.gmra.mxu1 %vm102_vm0, %v757_v2  ;;  %1675 = vmatmul.msk.f32.vlgmr.msrb.gmra.mxu3 %vm102_vm0, %v859_v3 }
  0x80   :  { %1658 = vmatmul.msk.f32.gmra.mxu0 %vm102_vm0, %v707_v4  ;;  %1670 = vmatmul.msk.f32.gmra.mxu2 %vm102_vm0, %v809_v5 }
  0x82   :  { %1664 = vmatmul.msk.f32.gmra.mxu1 %vm102_vm0, %v758_v6  ;;  %1676 = vmatmul.msk.f32.gmra.mxu3 %vm102_vm0, %v860_v7 }
  0x88   :  { %1659 = vmatmul.msk.f32.gmra.mxu0 %vm102_vm0, %v708_v8  ;;  %1671 = vmatmul.msk.f32.gmra.mxu2 %vm102_vm0, %v810_v9 }
  0x8a   :  { %1665 = vmatmul.msk.f32.gmra.mxu1 %vm102_vm0, %v759_v10  ;;  %1677 = vmatmul.msk.f32.gmra.mxu3 %vm102_vm0, %v861_v11 }
  0x90   :  { %1660 = vmatmul.msk.f32.gmra.mxu0 %vm102_vm0, %v709_v12  ;;  %1672 = vmatmul.msk.f32.gmra.mxu2 %vm102_vm0, %v811_v13 }
  0x92   :  { %1666 = vmatmul.msk.f32.gmra.mxu1 %vm102_vm0, %v760_v14  ;;  %1678 = vmatmul.msk.f32.gmra.mxu3 %vm102_vm0, %v862_v15  ;;  %v983_v14 = vlaneseq }
  0x94   :  { %v132_v16 = vpop.f32.mrf.mxu0 }
  0x97   :  { %v173_v17 = vpop.f32.mrf.mxu1 }
  0x98   :  { %v174_v28 = vadd.f32 %v173_v17, %v132_v16 }
  0x9b   :  { %v221_v18 = vpop.f32.mrf.mxu2 }
  0x9c   :  { %v233_v31 = vadd.f32 %v221_v18, %v174_v28 }
  0x9d   :  { %v135_v19 = vpop.f32.mrf.mxu0  ;;  %v273_v20 = vpop.f32.mrf.mxu3 }
  0x9e   :  { %v285_v34 = vadd.f32 %v273_v20, %v233_v31  ;;  %v2239_v20 = vshrl.u32 %v983_v14, 7 }
  0x9f   :  { %v176_v21 = vpop.f32.mrf.mxu1 }
  0xa0   :  { %v177_v38 = vadd.f32 %v176_v21, %v135_v19  ;;  %vm988_vm1 = vcmp.eq.s32.totalorder %v2239_v20, 0  ;;  %vm1200_vm6 = vcmp.eq.s32.totalorder %v2239_v20, 7  ;;  %vm1340_vm9 = vcmp.eq.s32.totalorder %v2239_v20, 4 }
  0xa1   :  { %vm1339_vm10 = vcmp.eq.s32.totalorder %v2239_v20, 3  ;;  %vm1341_vm11 = vmor %vm988_vm1, %vm1340_vm9  ;;  %vm1462_vm13 = vcmp.eq.s32.totalorder %v2239_v20, 2  ;;  %vm1461_vm14 = vcmp.eq.s32.totalorder %v2239_v20, 1 }
  0xa2   :  { %vm1342_vm12 = vmor %vm1339_vm10, %vm1200_vm6 }
  0xa3   :  { %v224_v22 = vpop.f32.mrf.mxu2  ;;  %vm1463_vm15 = vmor %vm988_vm1, %vm1462_vm13 }
  0xa4   :  { %v234_v43 = vadd.f32 %v224_v22, %v177_v38 }
  0xa5   :  { %v138_v23 = vpop.f32.mrf.mxu0  ;;  %v276_v24 = vpop.f32.mrf.mxu3 }
  0xa6   :  { %v286_v46 = vadd.f32 %v276_v24, %v234_v43 }
  0xa7   :  { %v179_v25 = vpop.f32.mrf.mxu1 }
  0xa8   :  { %v180_v51 = vadd.f32 %v179_v25, %v138_v23 }
  0xab   :  { %v227_v26 = vpop.f32.mrf.mxu2 }
  0xac   :  { %v235_v57 = vadd.f32 %v227_v26, %v180_v51 }
  0xad   :  { %v141_v27 = vpop.f32.mrf.mxu0  ;;  %v279_v29 = vpop.f32.mrf.mxu3 }
  0xae   :  { %v287_v62 = vadd.f32 %v279_v29, %v235_v57 }
  0xaf   :  { %v182_v30 = vpop.f32.mrf.mxu1 }
  0xb0   :  { %v183_v1 = vadd.f32 %v182_v30, %v141_v27 }
  0xb3   :  { %v230_v32 = vpop.f32.mrf.mxu2 }
  0xb4   :  { %v236_v6 = vadd.f32 %v230_v32, %v183_v1 }
  0xb5   :  { %v325_v36 = vpop.f32.mrf.mxu0  ;;  %v282_v39 = vpop.f32.mrf.mxu3 }
  0xb6   :  { %v337_v40 = vadd.f32 %v325_v36, %v285_v34  ;;  %v288_v11 = vadd.f32 %v282_v39, %v236_v6 }
  0xb7   :  { %v377_v42 = vpop.f32.mrf.mxu1 }
  0xb8   :  { %v389_v44 = vadd.f32 %v377_v42, %v337_v40 }
  0xbb   :  { %v429_v45 = vpop.f32.mrf.mxu2 }
  0xbc   :  { %v441_v47 = vadd.f32 %v429_v45, %v389_v44 }
  0xbd   :  { %v328_v49 = vpop.f32.mrf.mxu0  ;;  %v481_v53 = vpop.f32.mrf.mxu3 }
  0xbe   :  { %v338_v52 = vadd.f32 %v328_v49, %v286_v46  ;;  %v493_v55 = vadd.f32 %v481_v53, %v441_v47 }
  0xbf   :  { %v380_v56 = vpop.f32.mrf.mxu1 }
  0xc0   :  { %v498_v58 = vadd.f32 %v2229_v50, %v493_v55  ;;  %v390_v59 = vadd.f32 %v380_v56, %v338_v52 }
  0xc2   :  { %v502_v60 = vmax.f32 %v498_v58, 0.0 }
  0xc3   :  { %v432_v61 = vpop.f32.mrf.mxu2 }
  0xc4   :  { %v442_v63 = vadd.f32 %v432_v61, %v390_v59  ;;  %506 = vst.msk [vmem:[#allocation2 + $0x8] sm:$0xff] %vm102_vm0, %v502_v60 }
  0xc5   :  { %v331_v0 = vpop.f32.mrf.mxu0  ;;  %v484_v3 = vpop.f32.mrf.mxu3 }
  0xc6   :  { %v339_v2 = vadd.f32 %v331_v0, %v287_v62  ;;  %v494_v4 = vadd.f32 %v484_v3, %v442_v63 }
  0xc7   :  { %v383_v5 = vpop.f32.mrf.mxu1 }
  0xc8   :  { %v499_v7 = vadd.f32 %v2229_v50, %v494_v4  ;;  %v391_v8 = vadd.f32 %v383_v5, %v339_v2 }
  0xca   :  { %v503_v9 = vmax.f32 %v499_v7, 0.0 }
  0xcb   :  { %v435_v10 = vpop.f32.mrf.mxu2 }
  0xcc   :  { %v443_v12 = vadd.f32 %v435_v10, %v391_v8  ;;  %507 = vst.msk [vmem:[#allocation2 + $0x10] sm:$0xff] %vm102_vm0, %v503_v9 }
  0xcd   :  { %v334_v13 = vpop.f32.mrf.mxu0  ;;  %v487_v16 = vpop.f32.mrf.mxu3 }
  0xce   :  { %v340_v15 = vadd.f32 %v334_v13, %v288_v11  ;;  %v495_v17 = vadd.f32 %v487_v16, %v443_v12 }
  0xcf   :  { %v386_v18 = vpop.f32.mrf.mxu1 }
  0xd0   :  { %v500_v19 = vadd.f32 %v2229_v50, %v495_v17  ;;  %v392_v21 = vadd.f32 %v386_v18, %v340_v15 }
  0xd2   :  { %v504_v22 = vmax.f32 %v500_v19, 0.0 }
  0xd3   :  { %v438_v23 = vpop.f32.mrf.mxu2  ;;  %v944_v25 = vld [vmem:[#allocation2 + $0x8] ss:$2 sm:$0xff]  ;;  %v952_v26 = vld [vmem:[#allocation2 + $0x9] ss:$2 sm:$0xff] }
  0xd4   :  { %v444_v24 = vadd.f32 %v438_v23, %v392_v21  ;;  %v924_v27 = vld [vmem:[#allocation2 + $0x6] ss:$2 sm:$0xff]  ;;  %508 = vst.msk [vmem:[#allocation2 + $0x18] sm:$0xff] %vm102_vm0, %v504_v22  ;;  %v959_v29 = vmax.f32 %v944_v25, %v952_v26  ;;  %v932_v30 = vld [vmem:[#allocation2 + $0x7] ss:$2 sm:$0xff] }
  0xd5   :  { %v551_v28 = vpop.f32.mrf.mxu0  ;;  %v490_v31 = vpop.f32.mrf.mxu3  ;;  %v939_v32 = vmax.f32 %v924_v27, %v932_v30 }
  0xd6   :  { %v496_v33 = vadd.f32 %v490_v31, %v444_v24  ;;  %1681 = vmatmul.msk.f32.vlgmr.msra.gmra.mxu0 %vm102_vm0, %v959_v29  ;;  %v2255_v31 = vadd.s32 8, %v2239_v20 }
  0xd7   :  { %v592_v34 = vpop.f32.mrf.mxu1  ;;  %v1012_v35 = vsel %vm988_vm1, 0.0, %v939_v32 }
  0xd8   :  { %v501_v36 = vadd.f32 %v2229_v50, %v496_v33  ;;  %1685 = vmatmul.msk.f32.vlgmr.msra.gmra.mxu1 %vm102_vm0, %v1012_v35  ;;  %v593_v58 = vadd.f32 %v592_v34, %v551_v28  ;;  %vm993_vm2 = vcmp.eq.s32.totalorder %v2255_v31, 15  ;;  %vm1203_vm7 = vcmp.eq.s32.totalorder %v2255_v31, 8  ;;  %v1349_v31 = vld [vmem:[#allocation9 + $0x20] sm:$0xff] }
  0xda   :  { %v505_v37 = vmax.f32 %v501_v36, 0.0 }
  0xdb   :  { %v639_v38 = vpop.f32.mrf.mxu2  ;;  %v964_v39 = vld [vmem:[#allocation2 + $0xa] ss:$2 sm:$0xff]  ;;  %v972_v40 = vld [vmem:[#allocation2 + $0xb] ss:$2 sm:$0xff] }
  0xdc   :  { %509 = vst.msk [vmem:[#allocation2 + $0x20] sm:$0xff] %vm102_vm0, %v505_v37  ;;  %v979_v42 = vmax.f32 %v964_v39, %v972_v40  ;;  %v651_v61 = vadd.f32 %v639_v38, %v593_v58 }
  0xdd   :  { %v554_v41 = vpop.f32.mrf.mxu0  ;;  %v690_v43 = vpop.f32.mrf.mxu3 }
  0xde   :  { %1691 = vmatmul.msk.f32.vlgmr.msra.gmra.mxu2 %vm102_vm0, %v979_v42  ;;  %v702_v63 = vadd.f32 %v690_v43, %v651_v61 }
  0xdf   :  { %v595_v44 = vpop.f32.mrf.mxu1 }
  0xe0   :  { %v596_v1 = vadd.f32 %v595_v44, %v554_v41 }
  0xe3   :  { %v642_v45 = vpop.f32.mrf.mxu2  ;;  %v946_v46 = vld [vmem:[#allocation2 + $0x18] ss:$2 sm:$0xff]  ;;  %v954_v47 = vld [vmem:[#allocation2 + $0x19] ss:$2 sm:$0xff] }
  0xe4   :  { %v926_v48 = vld [vmem:[#allocation2 + $0x16] ss:$2 sm:$0xff]  ;;  %v960_v51 = vmax.f32 %v946_v46, %v954_v47  ;;  %v934_v52 = vld [vmem:[#allocation2 + $0x17] ss:$2 sm:$0xff]  ;;  %v652_v5 = vadd.f32 %v642_v45, %v596_v1 }
  0xe5   :  { %v557_v49 = vpop.f32.mrf.mxu0  ;;  %v693_v53 = vpop.f32.mrf.mxu3  ;;  %v940_v54 = vmax.f32 %v926_v48, %v934_v52  ;;  %v986_v48 = vadd.s32 16, %v2239_v20 }
  0xe6   :  { %1682 = vmatmul.msk.f32.gmra.mxu0 %vm102_vm0, %v960_v51  ;;  %v703_v8 = vadd.f32 %v693_v53, %v652_v5 }
  0xe7   :  { %v598_v55 = vpop.f32.mrf.mxu1  ;;  %1686 = vmatmul.msk.f32.gmra.mxu1 %vm102_vm0, %v940_v54  ;;  %vm998_vm3 = vcmp.eq.s32.totalorder %v986_v48, 16 }
  0xe8   :  { %v599_v11 = vadd.f32 %v598_v55, %v557_v49 }
  0xeb   :  { %v645_v56 = vpop.f32.mrf.mxu2 }
  0xec   :  { %v653_v16 = vadd.f32 %v645_v56, %v599_v11 }
  0xed   :  { %v560_v57 = vpop.f32.mrf.mxu0  ;;  %v696_v59 = vpop.f32.mrf.mxu3 }
  0xee   :  { %v704_v22 = vadd.f32 %v696_v59, %v653_v16 }
  0xef   :  { %v601_v60 = vpop.f32.mrf.mxu1 }
  0xf0   :  { %v602_v25 = vadd.f32 %v601_v60, %v560_v57 }
  0xf3   :  { %v648_v62 = vpop.f32.mrf.mxu2 }
  0xf4   :  { %v654_v30 = vadd.f32 %v648_v62, %v602_v25  ;;  %v1218_v25 = vld [vmem:[#allocation6 + $0x28] sm:$0xff] }
  0xf5   :  { %v741_v0 = vpop.f32.mrf.mxu0  ;;  %v699_v2 = vpop.f32.mrf.mxu3 }
  0xf6   :  { %v753_v3 = vadd.f32 %v741_v0, %v702_v63  ;;  %v705_v36 = vadd.f32 %v699_v2, %v654_v30  ;;  %v1282_v30 = vld [vmem:[#allocation6 + $0x50] sm:$0xff] }
  0xf7   :  { %v792_v4 = vpop.f32.mrf.mxu1 }
  0xf8   :  { %v804_v6 = vadd.f32 %v792_v4, %v753_v3  ;;  %v987_v4 = vadd.s32 24, %v2239_v20 }
  0xfa   :  { %vm1007_vm4 = vcmp.eq.s32.totalorder %v987_v4, 31 }
  0xfb   :  { %v843_v7 = vpop.f32.mrf.mxu2 }
  0xfc   :  { %v855_v9 = vadd.f32 %v843_v7, %v804_v6 }
  0xfd   :  { %v744_v10 = vpop.f32.mrf.mxu0  ;;  %v894_v13 = vpop.f32.mrf.mxu3 }
  0xfe   :  { %v754_v12 = vadd.f32 %v744_v10, %v703_v8  ;;  %v906_v14 = vadd.f32 %v894_v13, %v855_v9 }
  0xff   :  { %v795_v15 = vpop.f32.mrf.mxu1 }
 0x100   :  { %v910_v17 = vadd.f32 %v2229_v50, %v906_v14  ;;  %v805_v18 = vadd.f32 %v795_v15, %v754_v12 }
 0x102   :  { %v914_v19 = vmax.f32 %v910_v17, 0.0  ;;  %v1715_v17 = vld [vmem:[#allocation12 + $0x1] ss:$0 sm:$0xff] }
 0x103   :  { %v846_v21 = vpop.f32.mrf.mxu2 }
 0x104   :  { %v856_v23 = vadd.f32 %v846_v21, %v805_v18  ;;  %918 = vst.msk [vmem:[#allocation2 + $0x28] sm:$0xff] %vm102_vm0, %v914_v19 }
 0x105   :  { %v747_v24 = vpop.f32.mrf.mxu0  ;;  %v897_v27 = vpop.f32.mrf.mxu3 }
 0x106   :  { %v755_v26 = vadd.f32 %v747_v24, %v704_v22  ;;  %v907_v28 = vadd.f32 %v897_v27, %v856_v23  ;;  %v1220_v23 = vld [vmem:[#allocation6 + $0x38] sm:$0xff]  ;;  %v1219_v24 = vld [vmem:[#allocation6 + $0x30] sm:$0xff] }
 0x107   :  { %v798_v29 = vpop.f32.mrf.mxu1  ;;  %1239 = vmatpush.msra.mxu3 %v1220_v23  ;;  %v1283_v27 = vld [vmem:[#allocation6 + $0x58] sm:$0xff] }
 0x108   :  { %v911_v32 = vadd.f32 %v2229_v50, %v907_v28  ;;  %v806_v33 = vadd.f32 %v798_v29, %v755_v26  ;;  %v1217_v26 = vld [vmem:[#allocation6 + $0x20] sm:$0xff]  ;;  %1302 = vmatpush.msrb.mxu0 %v1283_v27  ;;  %v1414_v27 = vld [vmem:[#allocation9 + $0xa8] sm:$0xff] }
 0x109   :  { %1240 = vmatpush.msra.mxu3 %v1219_v24  ;;  %v1359_v24 = vld [vmem:[#allocation9 + $0x68] sm:$0xff] }
 0x10a   :  { %v915_v34 = vmax.f32 %v911_v32, 0.0  ;;  %1303 = vmatpush.msrb.mxu0 %v1282_v30  ;;  %v1281_v32 = vld [vmem:[#allocation6 + $0x48] sm:$0xff]  ;;  %v1413_v30 = vld [vmem:[#allocation9 + $0xa0] sm:$0xff] }
 0x10b   :  { %v849_v35 = vpop.f32.mrf.mxu2  ;;  %v966_v38 = vld [vmem:[#allocation2 + $0x1a] ss:$2 sm:$0xff]  ;;  %v974_v39 = vld [vmem:[#allocation2 + $0x1b] ss:$2 sm:$0xff]  ;;  %1241 = vmatpush.msra.mxu3 %v1218_v25  ;;  %v1348_v25 = vld [vmem:[#allocation9 + $0x18] sm:$0xff] }
 0x10c   :  { %v857_v37 = vadd.f32 %v849_v35, %v806_v33  ;;  %919 = vst.msk [vmem:[#allocation2 + $0x30] sm:$0xff] %vm102_vm0, %v915_v34  ;;  %v980_v41 = vmax.f32 %v966_v38, %v974_v39  ;;  %1304 = vmatpush.msrb.mxu0 %v1281_v32  ;;  %v1280_v35 = vld [vmem:[#allocation6 + $0x40] sm:$0xff]  ;;  %v1214_v38 = vld [vmem:[#allocation6 + $0x10] sm:$0xff]  ;;  %v1412_v32 = vld [vmem:[#allocation9 + $0x98] sm:$0xff] }
 0x10d   :  { %v750_v40 = vpop.f32.mrf.mxu0  ;;  %v900_v43 = vpop.f32.mrf.mxu3  ;;  %1242 = vmatpush.msra.mxu3 %v1217_v26  ;;  %v1358_v26 = vld [vmem:[#allocation9 + $0x60] sm:$0xff] }
 0x10e   :  { %v756_v42 = vadd.f32 %v750_v40, %v705_v36  ;;  %v908_v44 = vadd.f32 %v900_v43, %v857_v37  ;;  %v1017_v46 = vsel %vm993_vm2, 0.0, %v980_v41  ;;  %v1215_v36 = vld [vmem:[#allocation6 + $0x18] sm:$0xff]  ;;  %1305 = vmatpush.msrb.mxu0 %v1280_v35  ;;  %v1213_v41 = vld [vmem:[#allocation6 + $0x8] sm:$0xff]  ;;  %v1411_v35 = vld [vmem:[#allocation9 + $0x90] sm:$0xff] }
 0x10f   :  { %v801_v45 = vpop.f32.mrf.mxu1  ;;  %1692 = vmatmul.msk.f32.gmra.mxu2 %vm102_vm0, %v1017_v46  ;;  %1268 = vmatpush.msrb.mxu3 %v1215_v36  ;;  %v1355_v36 = vld [vmem:[#allocation9 + $0x48] sm:$0xff] }
 0x110   :  { %v912_v47 = vadd.f32 %v2229_v50, %v908_v44  ;;  %v807_v49 = vadd.f32 %v801_v45, %v756_v42  ;;  %v1212_v44 = vld [vmem:[#allocation6] sm:$0xff] }
 0x111   :  { %1269 = vmatpush.msrb.mxu3 %v1214_v38 }
 0x112   :  { %v916_v51 = vmax.f32 %v912_v47, 0.0 }
 0x113   :  { %v852_v52 = vpop.f32.mrf.mxu2  ;;  %v948_v54 = vld [vmem:[#allocation2 + $0x28] ss:$2 sm:$0xff]  ;;  %v956_v55 = vld [vmem:[#allocation2 + $0x29] ss:$2 sm:$0xff]  ;;  %1270 = vmatpush.msrb.mxu3 %v1213_v41  ;;  %v1409_v41 = vld [vmem:[#allocation9 + $0x80] sm:$0xff] }
 0x114   :  { %v858_v53 = vadd.f32 %v852_v52, %v807_v49  ;;  %v928_v56 = vld [vmem:[#allocation2 + $0x26] ss:$2 sm:$0xff]  ;;  %920 = vst.msk [vmem:[#allocation2 + $0x38] sm:$0xff] %vm102_vm0, %v916_v51  ;;  %v961_v57 = vmax.f32 %v948_v54, %v956_v55  ;;  %v936_v58 = vld [vmem:[#allocation2 + $0x27] ss:$2 sm:$0xff] }
 0x115   :  { %v903_v59 = vpop.f32.mrf.mxu3  ;;  %v941_v60 = vmax.f32 %v928_v56, %v936_v58  ;;  %1271 = vmatpush.msrb.mxu3 %v1212_v44 }
 0x116   :  { %v909_v61 = vadd.f32 %v903_v59, %v858_v53  ;;  %1683 = vmatmul.msk.f32.gmra.mxu0 %vm102_vm0, %v961_v57 }
 0x117   :  { %v1014_v62 = vsel %vm998_vm3, 0.0, %v941_v60 }
 0x118   :  { %v913_v63 = vadd.f32 %v2229_v50, %v909_v61  ;;  %1687 = vmatmul.msk.f32.gmra.mxu1 %vm102_vm0, %v1014_v62 }
 0x11a   :  { %v917_v0 = vmax.f32 %v913_v63, 0.0 }
 0x11b   :  { %v968_v1 = vld [vmem:[#allocation2 + $0x2a] ss:$2 sm:$0xff]  ;;  %v976_v2 = vld [vmem:[#allocation2 + $0x2b] ss:$2 sm:$0xff] }
 0x11c   :  { %921 = vst.msk [vmem:[#allocation2 + $0x40] sm:$0xff] %vm102_vm0, %v917_v0  ;;  %v981_v3 = vmax.f32 %v968_v1, %v976_v2 }
 0x11e   :  { %1693 = vmatmul.msk.f32.gmra.mxu2 %vm102_vm0, %v981_v3 }
 0x123   :  { %v950_v5 = vld [vmem:[#allocation2 + $0x38] ss:$2 sm:$0xff]  ;;  %v958_v6 = vld [vmem:[#allocation2 + $0x39] ss:$2 sm:$0xff] }
 0x124   :  { %v930_v7 = vld [vmem:[#allocation2 + $0x36] ss:$2 sm:$0xff]  ;;  %v962_v8 = vmax.f32 %v950_v5, %v958_v6  ;;  %v938_v9 = vld [vmem:[#allocation2 + $0x37] ss:$2 sm:$0xff] }
 0x125   :  { %v970_v10 = vld [vmem:[#allocation2 + $0x3a] ss:$2 sm:$0xff]  ;;  %v978_v50 = vld [vmem:[#allocation2 + $0x3b] ss:$2 sm:$0xff]  ;;  %v942_v11 = vmax.f32 %v930_v7, %v938_v9 }
 0x126   :  { %v982_v12 = vmax.f32 %v970_v10, %v978_v50  ;;  %1684 = vmatmul.msk.f32.gmra.mxu0 %vm102_vm0, %v962_v8 }
 0x127   :  { %1688 = vmatmul.msk.f32.gmra.mxu1 %vm102_vm0, %v942_v11 }
 0x128   :  { %v1019_v13 = vsel %vm1007_vm4, 0.0, %v982_v12 }
 0x129   :  { %1694 = vmatmul.msk.f32.gmra.mxu2 %vm102_vm0, %v1019_v13  ;;  %vm1464_vm0 = vmor %vm1461_vm14, %vm1339_vm10 }
 0x153   :  { %v1054_v14 = vpop.f32.mrf.mxu0 }
 0x155   :  { %v1095_v15 = vpop.f32.mrf.mxu1 }
 0x156   :  { %v1096_v16 = vadd.f32 %v1095_v15, %v1054_v14  ;;  %v1352_v15 = vld [vmem:[#allocation9 + $0x38] sm:$0xff] }
 0x157   :  { %1396 = vmatpush.msrb.mxu2 %v1352_v15  ;;  %v1470_v15 = vld [vmem:[#allocation11 + $0x18] sm:$0xff] }
 0x161   :  { %v1139_v18 = vpop.f32.mrf.mxu2 }
 0x162   :  { %v1151_v19 = vadd.f32 %v1139_v18, %v1096_v16  ;;  %v1351_v16 = vld [vmem:[#allocation9 + $0x30] sm:$0xff]  ;;  %v1350_v18 = vld [vmem:[#allocation9 + $0x28] sm:$0xff] }
 0x163   :  { %v1057_v28 = vpop.f32.mrf.mxu0  ;;  %1397 = vmatpush.msrb.mxu2 %v1351_v16  ;;  %v1534_v16 = vld [vmem:[#allocation11 + $0x98] sm:$0xff] }
 0x164   :  { %v1156_v21 = vadd.f32 %v1715_v17, %v1151_v19  ;;  %v1098_v29 = vpop.f32.mrf.mxu1  ;;  %v1360_v19 = vld [vmem:[#allocation9 + $0x70] sm:$0xff] }
 0x165   :  { %v1099_v33 = vadd.f32 %v1098_v29, %v1057_v28  ;;  %1398 = vmatpush.msrb.mxu2 %v1350_v18  ;;  %v1357_v28 = vld [vmem:[#allocation9 + $0x58] sm:$0xff]  ;;  %v1347_v29 = vld [vmem:[#allocation9 + $0x10] sm:$0xff] }
 0x166   :  { %v1160_v22 = vmax.f32 %v1156_v21, 0.0  ;;  %v1416_v21 = vld [vmem:[#allocation9 + $0xb8] sm:$0xff]  ;;  %v1469_v18 = vld [vmem:[#allocation11 + $0x10] sm:$0xff] }
 0x167   :  { %1399 = vmatpush.msrb.mxu2 %v1349_v31  ;;  %v1467_v31 = vld [vmem:[#allocation11] sm:$0xff] }
 0x168   :  { %1165 = vst.msk [vmem:[#allocation3 + $0x8] sm:$0xff] %vm1164_vm5, %v1160_v22  ;;  %v1415_v22 = vld [vmem:[#allocation9 + $0xb0] sm:$0xff] }
 0x169   :  { %1400 = vmatpush.msrb.mxu2 %v1348_v25  ;;  %v1531_v25 = vld [vmem:[#allocation11 + $0x80] sm:$0xff] }
 0x16b   :  { %1401 = vmatpush.msrb.mxu2 %v1347_v29  ;;  %v1717_v29 = vld [vmem:[#allocation12 + $0x3] ss:$0 sm:$0xff] }
 0x192   :  { %v1142_v34 = vpop.f32.mrf.mxu2 }
 0x193   :  { %v1152_v37 = vadd.f32 %v1142_v34, %v1099_v33  ;;  %v1060_v42 = vpop.f32.mrf.mxu0  ;;  %v1356_v33 = vld [vmem:[#allocation9 + $0x50] sm:$0xff]  ;;  %v1346_v34 = vld [vmem:[#allocation9 + $0x8] sm:$0xff] }
 0x194   :  { %1402 = vmatpush.msrb.mxu2 %v1346_v34 }
 0x195   :  { %v1157_v39 = vadd.f32 %v1715_v17, %v1152_v37  ;;  %v1101_v43 = vpop.f32.mrf.mxu1  ;;  %v1345_v37 = vld [vmem:[#allocation9] sm:$0xff] }
 0x196   :  { %v1102_v45 = vadd.f32 %v1101_v43, %v1060_v42  ;;  %1403 = vmatpush.msrb.mxu2 %v1345_v37 }
 0x197   :  { %v1161_v40 = vmax.f32 %v1157_v39, 0.0  ;;  %v1410_v39 = vld [vmem:[#allocation9 + $0x88] sm:$0xff] }
 0x199   :  { %1166 = vst.msk [vmem:[#allocation3 + $0x10] sm:$0xff] %vm1164_vm5, %v1161_v40  ;;  %v1354_v40 = vld [vmem:[#allocation9 + $0x40] sm:$0xff] }
 0x1a0   :  { %v1181_v46 = vld [vmem:[#allocation3 + $0x8] ss:$2 sm:$0xff]  ;;  %v1185_v47 = vld [vmem:[#allocation3 + $0x9] ss:$2 sm:$0xff] }
 0x1a1   :  { %v1145_v48 = vpop.f32.mrf.mxu2  ;;  %v1188_v49 = vmax.f32 %v1181_v46, %v1185_v47  ;;  %v1171_v7 = vld [vmem:[#allocation3 + $0x6] ss:$2 sm:$0xff]  ;;  %v1175_v8 = vld [vmem:[#allocation3 + $0x7] ss:$2 sm:$0xff] }
 0x1a2   :  { %v1153_v51 = vadd.f32 %v1145_v48, %v1102_v45  ;;  %v1178_v10 = vmax.f32 %v1171_v7, %v1175_v8  ;;  %v1716_v45 = vld [vmem:[#allocation12 + $0x2] ss:$0 sm:$0xff]  ;;  %v1473_v7 = vld [vmem:[#allocation11 + $0x30] sm:$0xff] }
 0x1a3   :  { %1695 = vmatmul.msk.f32.vlgmr.msra.gmra.mxu3 %vm1164_vm5, %v1188_v49  ;;  %v1063_v54 = vpop.f32.mrf.mxu0  ;;  %v1537_v8 = vld [vmem:[#allocation11 + $0xb0] sm:$0xff] }
 0x1a4   :  { %v1158_v52 = vadd.f32 %v1715_v17, %v1153_v51  ;;  %v1104_v55 = vpop.f32.mrf.mxu1  ;;  %v1208_v50 = vsel %vm988_vm1, 0.0, %v1178_v10  ;;  %1428 = vmatpush.msra.mxu3 %v1416_v21  ;;  %v1472_v10 = vld [vmem:[#allocation11 + $0x28] sm:$0xff]  ;;  %vm1566_vm1 = vcmask 519168  }
 0x1a5   :  { %v1105_v56 = vadd.f32 %v1104_v55, %v1063_v54  ;;  %v1477_v21 = vld [vmem:[#allocation11 + $0x48] sm:$0xff] }
 0x1a6   :  { %v1162_v53 = vmax.f32 %v1158_v52, 0.0  ;;  %1429 = vmatpush.msra.mxu3 %v1415_v22  ;;  %v1468_v22 = vld [vmem:[#allocation11 + $0x8] sm:$0xff] }
 0x1a8   :  { %1167 = vst.msk [vmem:[#allocation3 + $0x18] sm:$0xff] %vm1164_vm5, %v1162_v53  ;;  %1430 = vmatpush.msra.mxu3 %v1414_v27 }
 0x1aa   :  { %1431 = vmatpush.msra.mxu3 %v1413_v30 }
 0x1ac   :  { %v1148_v57 = vpop.f32.mrf.mxu2  ;;  %1432 = vmatpush.msra.mxu3 %v1412_v32 }
 0x1ad   :  { %v1154_v58 = vadd.f32 %v1148_v57, %v1105_v56 }
 0x1ae   :  { %1433 = vmatpush.msra.mxu3 %v1411_v35 }
 0x1af   :  { %v1159_v59 = vadd.f32 %v1715_v17, %v1154_v58  ;;  %v1191_v60 = vld [vmem:[#allocation3 + $0xa] ss:$2 sm:$0xff]  ;;  %v1195_v61 = vld [vmem:[#allocation3 + $0xb] ss:$2 sm:$0xff]  ;;  %v1361_v17 = vld [vmem:[#allocation9 + $0x78] sm:$0xff] }
 0x1b0   :  { %v1198_v63 = vmax.f32 %v1191_v60, %v1195_v61  ;;  %1373 = vmatpush.msrb.mxu1 %v1361_v17  ;;  %1434 = vmatpush.msra.mxu3 %v1410_v39  ;;  %v1478_v17 = vld [vmem:[#allocation11 + $0x50] sm:$0xff] }
 0x1b1   :  { %v1163_v62 = vmax.f32 %v1159_v59, 0.0 }
 0x1b2   :  { %v1210_v0 = vsel %vm1200_vm6, 0.0, %v1198_v63  ;;  %1374 = vmatpush.msrb.mxu1 %v1360_v19  ;;  %1435 = vmatpush.msra.mxu3 %v1409_v41  ;;  %v1533_v19 = vld [vmem:[#allocation11 + $0x90] sm:$0xff] }
 0x1b3   :  { %1168 = vst.msk [vmem:[#allocation3 + $0x20] sm:$0xff] %vm1164_vm5, %v1163_v62  ;;  %1699 = vmatmul.msk.f32.vlgmr.msrb.gmra.mxu0 %vm1164_vm5, %v1210_v0 }
 0x1b4   :  { %1375 = vmatpush.msrb.mxu1 %v1359_v24  ;;  %v1476_v24 = vld [vmem:[#allocation11 + $0x40] sm:$0xff] }
 0x1b6   :  { %1376 = vmatpush.msrb.mxu1 %v1358_v26 }
 0x1b8   :  { %1377 = vmatpush.msrb.mxu1 %v1357_v28 }
 0x1ba   :  { %v1183_v1 = vld [vmem:[#allocation3 + $0x18] ss:$2 sm:$0xff]  ;;  %v1187_v2 = vld [vmem:[#allocation3 + $0x19] ss:$2 sm:$0xff]  ;;  %1378 = vmatpush.msrb.mxu1 %v1356_v33 }
 0x1bb   :  { %v1193_v3 = vld [vmem:[#allocation3 + $0x1a] ss:$2 sm:$0xff]  ;;  %v1189_v4 = vmax.f32 %v1183_v1, %v1187_v2  ;;  %v1197_v5 = vld [vmem:[#allocation3 + $0x1b] ss:$2 sm:$0xff] }
 0x1bc   :  { %v1199_v6 = vmax.f32 %v1193_v3, %v1197_v5  ;;  %v1173_v11 = vld [vmem:[#allocation3 + $0x16] ss:$2 sm:$0xff]  ;;  %v1177_v12 = vld [vmem:[#allocation3 + $0x17] ss:$2 sm:$0xff]  ;;  %1379 = vmatpush.msrb.mxu1 %v1355_v36 }
 0x1bd   :  { %1696 = vmatmul.msk.f32.gmra.mxu3 %vm1164_vm5, %v1189_v4  ;;  %v1179_v13 = vmax.f32 %v1173_v11, %v1177_v12  ;;  %v1483_v3 = vld [vmem:[#allocation11 + $0x78] sm:$0xff]  ;;  %v1480_v11 = vld [vmem:[#allocation11 + $0x60] sm:$0xff] }
 0x1be   :  { %v1211_v9 = vsel %vm993_vm2, 0.0, %v1199_v6  ;;  %1380 = vmatpush.msrb.mxu1 %v1354_v40  ;;  %1495 = vmatpush.msra.mxu0 %v1483_v3  ;;  %v1474_v4 = vld [vmem:[#allocation11 + $0x38] sm:$0xff]  ;;  %v1482_v6 = vld [vmem:[#allocation11 + $0x70] sm:$0xff]  ;;  %v1471_v12 = vld [vmem:[#allocation11 + $0x20] sm:$0xff] }
 0x1bf   :  { %1700 = vmatmul.msk.f32.gmra.mxu0 %vm1164_vm5, %v1211_v9  ;;  %v1209_v14 = vsel %vm1203_vm7, 0.0, %v1179_v13  ;;  %v1538_v5 = vld [vmem:[#allocation11 + $0xb8] sm:$0xff]  ;;  %v1481_v9 = vld [vmem:[#allocation11 + $0x68] sm:$0xff]  ;;  %v1535_v13 = vld [vmem:[#allocation11 + $0xa0] sm:$0xff] }
 0x1c0   :  { %1518 = vmatpush.msra.mxu1 %v1474_v4  ;;  %1550 = vmatpush.msra.mxu2 %v1538_v5 }
 0x1c1   :  { %1496 = vmatpush.msra.mxu0 %v1482_v6 }
 0x1c2   :  { %1519 = vmatpush.msra.mxu1 %v1473_v7  ;;  %1551 = vmatpush.msra.mxu2 %v1537_v8 }
 0x1c3   :  { %1497 = vmatpush.msra.mxu0 %v1481_v9 }
 0x1c4   :  { %1520 = vmatpush.msra.mxu1 %v1472_v10 }
 0x1c5   :  { %1697 = vmatmul.msk.f32.vlgmr.msrb.gmra.mxu3 %vm1164_vm5, %v1208_v50  ;;  %v1536_v50 = vld [vmem:[#allocation11 + $0xa8] sm:$0xff]  ;;  %1498 = vmatpush.msra.mxu0 %v1480_v11 }
 0x1c6   :  { %1552 = vmatpush.msra.mxu2 %v1536_v50  ;;  %1521 = vmatpush.msra.mxu1 %v1471_v12 }
 0x1c8   :  { %1553 = vmatpush.msra.mxu2 %v1535_v13  ;;  %1522 = vmatpush.msra.mxu1 %v1470_v15 }
 0x1ca   :  { %1554 = vmatpush.msra.mxu2 %v1534_v16  ;;  %1523 = vmatpush.msra.mxu1 %v1469_v18 }
 0x1cc   :  { %1555 = vmatpush.msra.mxu2 %v1533_v19  ;;  %1524 = vmatpush.msra.mxu1 %v1468_v22 }
 0x1cd   :  { %1698 = vmatmul.msk.f32.gmra.mxu3 %vm1164_vm5, %v1209_v14  ;;  %v1479_v14 = vld [vmem:[#allocation11 + $0x58] sm:$0xff] }
 0x1ce   :  { %1499 = vmatpush.msra.mxu0 %v1479_v14  ;;  %1525 = vmatpush.msra.mxu1 %v1467_v31 }
 0x1d0   :  { %1500 = vmatpush.msra.mxu0 %v1478_v17 }
 0x1d2   :  { %1501 = vmatpush.msra.mxu0 %v1477_v21 }
 0x1d4   :  { %1502 = vmatpush.msra.mxu0 %v1476_v24 }
 0x226   :  { %v1244_v23 = vpop.f32.mrf.mxu3 }
 0x230   :  { %v1307_v42 = vpop.f32.mrf.mxu0 }
 0x23c   :  { %v1310_v52 = vpop.f32.mrf.mxu0 }
 0x240   :  { %v1247_v38 = vpop.f32.mrf.mxu3 }
 0x248   :  { %v1273_v43 = vpop.f32.mrf.mxu3 }
 0x249   :  { %v1274_v44 = vadd.f32 %v1273_v43, %v1244_v23  ;;  %v1532_v23 = vld [vmem:[#allocation11 + $0x88] sm:$0xff] }
 0x24a   :  { %1556 = vmatpush.msra.mxu2 %v1532_v23 }
 0x24b   :  { %v1313_v46 = vadd.f32 %v1307_v42, %v1274_v44 }
 0x24c   :  { %1557 = vmatpush.msra.mxu2 %v1531_v25 }
 0x24d   :  { %v1316_v47 = vadd.f32 %v1716_v45, %v1313_v46 }
 0x24f   :  { %v1318_v48 = vmax.f32 %v1316_v47, 0.0 }
 0x250   :  { %v1276_v49 = vpop.f32.mrf.mxu3 }
 0x251   :  { %1321 = vst.msk [vmem:[#allocation4 + $0x8] sm:$0xff] %vm1320_vm8, %v1318_v48  ;;  %v1277_v51 = vadd.f32 %v1276_v49, %v1247_v38  ;;  %v1718_v49 = vld [vmem:[#allocation12 + $0x4] ss:$0 sm:$0xff] }
 0x253   :  { %v1314_v53 = vadd.f32 %v1310_v52, %v1277_v51 }
 0x255   :  { %v1317_v54 = vadd.f32 %v1716_v45, %v1314_v53 }
 0x257   :  { %v1319_v55 = vmax.f32 %v1317_v54, 0.0 }
 0x259   :  { %1322 = vst.msk [vmem:[#allocation4 + $0x10] sm:$0xff] %vm1320_vm8, %v1319_v55 }
 0x260   :  { %v1330_v56 = vld [vmem:[#allocation4 + $0x8] ss:$2 sm:$0xff]  ;;  %v1332_v57 = vld [vmem:[#allocation4 + $0x9] ss:$2 sm:$0xff] }
 0x261   :  { %v1325_v58 = vld [vmem:[#allocation4 + $0x6] ss:$2 sm:$0xff]  ;;  %v1333_v59 = vmax.f32 %v1330_v56, %v1332_v57  ;;  %v1327_v60 = vld [vmem:[#allocation4 + $0x7] ss:$2 sm:$0xff] }
 0x262   :  { %v1335_v61 = vld [vmem:[#allocation4 + $0xa] ss:$2 sm:$0xff]  ;;  %v1337_v62 = vld [vmem:[#allocation4 + $0xb] ss:$2 sm:$0xff]  ;;  %v1328_v63 = vmax.f32 %v1325_v58, %v1327_v60 }
 0x263   :  { %v1338_v0 = vmax.f32 %v1335_v61, %v1337_v62  ;;  %1701 = vmatmul.msk.f32.vlgmr.msrb.gmra.mxu1 %vm1320_vm8, %v1333_v59 }
 0x264   :  { %v1343_v1 = vsel %vm1341_vm11, 0.0, %v1328_v63 }
 0x265   :  { %v1344_v2 = vsel %vm1342_vm12, 0.0, %v1338_v0  ;;  %1702 = vmatmul.msk.f32.vlgmr.msrb.gmra.mxu2 %vm1320_vm8, %v1343_v1 }
 0x266   :  { %1703 = vmatmul.msk.f32.vlgmr.msra.gmra.mxu3 %vm1320_vm8, %v1344_v2 }
 0x2e0   :  { %v1382_v26 = vpop.f32.mrf.mxu1 }
 0x2e8   :  { %v1405_v27 = vpop.f32.mrf.mxu2 }
 0x2e9   :  { %v1406_v28 = vadd.f32 %v1405_v27, %v1382_v26  ;;  %v1437_v30 = vpop.f32.mrf.mxu3 }
 0x2eb   :  { %v1440_v32 = vadd.f32 %v1437_v30, %v1406_v28 }
 0x2ed   :  { %v1442_v33 = vadd.f32 %v1717_v29, %v1440_v32 }
 0x2ef   :  { %v1443_v34 = vmax.f32 %v1442_v33, 0.0 }
 0x2f1   :  { %1444 = vst.msk [vmem:[#allocation5 + $0x8] sm:$0xff] %vm1320_vm8, %v1443_v34 }
 0x2f8   :  { %v1452_v35 = vld [vmem:[#allocation5 + $0x8] ss:$2 sm:$0xf]  ;;  %v1454_v36 = vld [vmem:[#allocation5 + $0x9] ss:$2 sm:$0xf] }
 0x2f9   :  { %v1455_v37 = vmax.f32 %v1452_v35, %v1454_v36  ;;  %v1447_v38 = vld [vmem:[#allocation5 + $0x6] ss:$2 sm:$0xf]  ;;  %v1449_v39 = vld [vmem:[#allocation5 + $0x7] ss:$2 sm:$0xf] }
 0x2fa   :  { %v1450_v40 = vmax.f32 %v1447_v38, %v1449_v39  ;;  %v1457_v41 = vld [vmem:[#allocation5 + $0xa] ss:$2 sm:$0xf]  ;;  %v1459_v42 = vld [vmem:[#allocation5 + $0xb] ss:$2 sm:$0xf] }
 0x2fb   :  { %1704 = vmatmul.msk.f32.vlgmr.msra.gmra.mxu0 %vm1320_vm8, %v1455_v37  ;;  %v1460_v43 = vmax.f32 %v1457_v41, %v1459_v42 }
 0x2fc   :  { %v1465_v44 = vsel %vm1463_vm15, 0.0, %v1450_v40 }
 0x2fd   :  { %1705 = vmatmul.msk.f32.vlgmr.msra.gmra.mxu1 %vm1320_vm8, %v1465_v44  ;;  %v1466_v45 = vsel %vm1464_vm0, 0.0, %v1460_v43 }
 0x2fe   :  { %1706 = vmatmul.msk.f32.vlgmr.msra.gmra.mxu2 %vm1320_vm8, %v1466_v45 }
 0x378   :  { %v1504_v46 = vpop.f32.mrf.mxu0 }
 0x37a   :  { %v1527_v47 = vpop.f32.mrf.mxu1 }
 0x37b   :  { %v1528_v48 = vadd.f32 %v1527_v47, %v1504_v46 }
 0x381   :  { %v1559_v51 = vpop.f32.mrf.mxu2 }
 0x382   :  { %v1562_v52 = vadd.f32 %v1559_v51, %v1528_v48 }
 0x384   :  { %v1564_v20 = vadd.f32 %v1718_v49, %v1562_v52 }
 0x386   :  { %v1565_v53 = vmax.f32 %v1564_v20, 0.0 }
 0x388   :  { %1567 = vst.msk [vmem:[#allocation14] sm:$0xf] %vm1566_vm1, %v1565_v53 }
 0x389   :  { %1578 = dma.vmem_to_hbm [thread:$0]  %s1574_s23, 64, %s1576_s26, [#allocation8]  }
 0x38a   :  { %1845 = dma.done.wait [#allocation8], 64  }
 0x38b   :  { %1846 = vsyncadd [#allocation8], 4294967232 }
 0x38c   :  { %1583 = vsyncpa [#allocation7], 1 }
 0x38d   :  { %1584 = vsyncpa [#allocation10], 1 }
 0x38e   :  { %1585 = vsyncpa [#allocation13], 1 }
 0x38f   :  { %1586 = vsyncpa [#allocation8], 1 }

</bundles_post_ra>
